<compile_context>
chip_gen: v7x
topology: tpu7x:2x2x1
jax: 0.10.0
libtpu: 0.0.40
codegen_flags: <defaults>
</compile_context>

<pallas_src>
import functools

import jax
import jax.numpy as jnp
from jax.experimental import pallas as pl
from jax.experimental.pallas import tpu as pltpu

INPUT_SIZE = 2048 * 3          # forced by x.view(-1, 2048*3) in the forward
HIDDEN_SIZE = 128
LATENT_SIZE = 32
TM_DEFAULT = 512               # row tile: 2*(512*6144*4B) x-bufs + bf16 tile + W1 ≈ 34 MiB
VMEM_LIMIT_BYTES = 48 * 1024 * 1024


def encoder_kernel(x_ref, w1_ref, b1_ref, w2_ref, b2_ref, out_ref):
    """One row-tile: h = relu(bf16(x)@W1 + b1) in f32, then out = h@W2 + b2."""
    # x arrives as f32 straight from HBM; cast on-chip (VPU has huge slack here).
    x_bf = x_ref[...].astype(jnp.bfloat16)
    h = jnp.dot(x_bf, w1_ref[...], preferred_element_type=jnp.float32)
    h = jnp.maximum(h + b1_ref[...], 0.0)
    out_ref[...] = (
        jnp.dot(h, w2_ref[...], preferred_element_type=jnp.float32)
        + b2_ref[...]
    ).astype(out_ref.dtype)


@functools.partial(jax.jit, static_argnames=("tm",))
def encoder_forward(x, w1, b1, w2, b2, *, tm=TM_DEFAULT):
    # Flatten exactly like x.view(-1, 2048*3)
    xf = x.reshape(-1, INPUT_SIZE)
    n = xf.shape[0]

    # Shrink the row tile for small batches.  When tm == n the block equals the
    # full array extent (always a legal block shape); when n > tm any ragged
    # last block is handled by Pallas bounds clipping — no padding pass needed.
    tm = min(tm, n)

    # One-time tiny cast of the resident weight (3 MiB -> 1.5 MiB); everything
    # downstream of the first matmul stays in f32.
    w1_bf = w1.astype(jnp.bfloat16)

    grid = (pl.cdiv(n, tm),)

    out = pl.pallas_call(
        encoder_kernel,
        out_shape=jax.ShapeDtypeStruct((n, LATENT_SIZE), jnp.float32),
        grid_spec=pltpu.PrefetchScalarGridSpec(
            num_scalar_prefetch=0,
            grid=grid,
            in_specs=[
                pl.BlockSpec((tm, INPUT_SIZE), lambda i: (i, 0)),           # x row tile (f32)
                pl.BlockSpec((INPUT_SIZE, HIDDEN_SIZE), lambda i: (0, 0)),  # W1 (resident, bf16)
                pl.BlockSpec((1, HIDDEN_SIZE), lambda i: (0, 0)),           # b1
                pl.BlockSpec((HIDDEN_SIZE, LATENT_SIZE), lambda i: (0, 0)),  # W2
                pl.BlockSpec((1, LATENT_SIZE), lambda i: (0, 0)),           # b2
            ],
            out_specs=pl.BlockSpec((tm, LATENT_SIZE), lambda i: (i, 0)),
        ),
        compiler_params=pltpu.CompilerParams(
            dimension_semantics=("parallel",),
            vmem_limit_bytes=VMEM_LIMIT_BYTES,
        ),
    )(xf, w1_bf, b1, w2, b2)

    return out


def init_linear(key, fan_in, fan_out):
    # Mirrors torch.nn.Linear default init: U(-1/sqrt(fan_in), 1/sqrt(fan_in)).
    kw, kb = jax.random.split(key)
    bound = 1.0 / jnp.sqrt(fan_in)
    w = jax.random.uniform(kw, (fan_in, fan_out), jnp.float32, -bound, bound)
    b = jax.random.uniform(kb, (1, fan_out), jnp.float32, -bound, bound)
    return w, b


if __name__ == "__main__":
    key = jax.random.PRNGKey(0)
    kx, k1, k2 = jax.random.split(key, 3)

    # Input shaped like a point cloud (B, 2048, 3); forward flattens to (B, 6144).
    x = jax.random.normal(kx, (2, 2048, 3), jnp.float32)
    w1, b1 = init_linear(k1, INPUT_SIZE, HIDDEN_SIZE)
    w2, b2 = init_linear(k2, HIDDEN_SIZE, LATENT_SIZE)

    out = encoder_forward(x, w1, b1, w2, b2)
    out = jax.block_until_ready(out)

    # Reference matching the kernel's numerics (bf16 fc1 inputs, f32 accumulate).
    xf = x.reshape(-1, INPUT_SIZE)
    h_ref = jnp.maximum(
        jnp.dot(xf.astype(jnp.bfloat16), w1.astype(jnp.bfloat16),
                preferred_element_type=jnp.float32) + b1, 0.0)
    ref = jnp.dot(h_ref, w2, preferred_element_type=jnp.float32) + b2

    # Also sanity-check against the pure-f32 PyTorch-equivalent math (loose tol).
    # NOTE: bf16 fc1 inputs are a deliberate accuracy tradeoff vs pure-f32 torch math.
    ref_f32 = jnp.maximum(xf @ w1 + b1, 0.0) @ w2 + b2

    assert out.shape == (2, LATENT_SIZE)
    assert jnp.allclose(out, ref, atol=1e-3, rtol=1e-3)
    assert jnp.allclose(out, ref_f32, atol=5e-2, rtol=5e-2)

    print("KERNEL_OK")
</pallas_src>

<mosaic_0001>
module attributes {stable_mosaic.version = 11 : i64} {
  func.func @encoder_kernel(%arg0: i32, %arg1: memref<2x6144xf32, #tpu.memory_space<vmem>>, %arg2: memref<6144x128xbf16, #tpu.memory_space<vmem>>, %arg3: memref<1x128xf32, #tpu.memory_space<vmem>>, %arg4: memref<128x32xf32, #tpu.memory_space<vmem>>, %arg5: memref<1x32xf32, #tpu.memory_space<vmem>>, %arg6: memref<2x32xf32, #tpu.memory_space<vmem>>) attributes {dimension_semantics = [#tpu.dimension_semantics<parallel>], iteration_bounds = array<i64: 1>, scalar_prefetch = 0 : i64, scratch_operands = 0 : i64, tpu.core_type = #tpu.core_type<tc>, window_params = [{transform_indices = @transform_0, window_bounds = array<i64: 2, 6144>}, {pipeline_mode = #tpu.pipeline_mode<synchronous>, transform_indices = @transform_1, window_bounds = array<i64: 6144, 128>}, {pipeline_mode = #tpu.pipeline_mode<synchronous>, transform_indices = @transform_2, window_bounds = array<i64: 1, 128>}, {pipeline_mode = #tpu.pipeline_mode<synchronous>, transform_indices = @transform_3, window_bounds = array<i64: 128, 32>}, {pipeline_mode = #tpu.pipeline_mode<synchronous>, transform_indices = @transform_4, window_bounds = array<i64: 1, 32>}, {transform_indices = @transform_5, window_bounds = array<i64: 2, 32>}]} {
    %c0 = arith.constant 0 : index
    %c0_0 = arith.constant 0 : index
    %0 = vector.load %arg1[%c0, %c0_0] : memref<2x6144xf32, #tpu.memory_space<vmem>>, vector<2x6144xf32>
    %1 = arith.truncf %0 : vector<2x6144xf32> to vector<2x6144xbf16>
    %c0_1 = arith.constant 0 : index
    %c0_2 = arith.constant 0 : index
    %2 = vector.load %arg2[%c0_1, %c0_2] : memref<6144x128xbf16, #tpu.memory_space<vmem>>, vector<6144x128xbf16>
    %cst = arith.constant dense<0.000000e+00> : vector<2x128xf32>
    %3 = tpu.matmul %1, %2, %cst {dimension_numbers = #tpu.dot_dimension_numbers<[1], [0], [0], [1], [0, 0, 1, 1], [], []>} : vector<2x6144xbf16>, vector<6144x128xbf16>, vector<2x128xf32> -> vector<2x128xf32>
    %c0_3 = arith.constant 0 : index
    %c0_4 = arith.constant 0 : index
    %4 = vector.load %arg3[%c0_3, %c0_4] : memref<1x128xf32, #tpu.memory_space<vmem>>, vector<1x128xf32>
    %5 = vector.broadcast %4 : vector<1x128xf32> to vector<2x128xf32>
    %6 = arith.addf %3, %5 : vector<2x128xf32>
    %cst_5 = arith.constant 0.000000e+00 : f32
    %7 = vector.broadcast %cst_5 : f32 to vector<2x128xf32>
    %8 = arith.maximumf %6, %7 : vector<2x128xf32>
    %c0_6 = arith.constant 0 : index
    %c0_7 = arith.constant 0 : index
    %9 = vector.load %arg4[%c0_6, %c0_7] : memref<128x32xf32, #tpu.memory_space<vmem>>, vector<128x32xf32>
    %cst_8 = arith.constant dense<0.000000e+00> : vector<2x32xf32>
    %10 = tpu.matmul %8, %9, %cst_8 {dimension_numbers = #tpu.dot_dimension_numbers<[1], [0], [0], [1], [0, 0, 1, 1], [], []>} : vector<2x128xf32>, vector<128x32xf32>, vector<2x32xf32> -> vector<2x32xf32>
    %c0_9 = arith.constant 0 : index
    %c0_10 = arith.constant 0 : index
    %11 = vector.load %arg5[%c0_9, %c0_10] : memref<1x32xf32, #tpu.memory_space<vmem>>, vector<1x32xf32>
    %12 = vector.broadcast %11 : vector<1x32xf32> to vector<2x32xf32>
    %13 = arith.addf %10, %12 : vector<2x32xf32>
    %c0_11 = arith.constant 0 : index
    %c0_12 = arith.constant 0 : index
    %14 = vector.load %arg6[%c0_11, %c0_12] : memref<2x32xf32, #tpu.memory_space<vmem>>, vector<2x32xf32>
    tpu.vector_store %arg6[%c0_11, %c0_12], %13 {strides = array<i32>} : memref<2x32xf32, #tpu.memory_space<vmem>>, vector<2x32xf32>,
    return
  }
  func.func @transform_0(%arg0: i32) -> (i32, i32) {
    %c0_i32 = arith.constant 0 : i32
    %c0_i32_0 = arith.constant 0 : i32
    return %arg0, %c0_i32 : i32, i32
  }
  func.func @transform_1(%arg0: i32) -> (i32, i32) {
    %c0_i32 = arith.constant 0 : i32
    %c0_i32_0 = arith.constant 0 : i32
    %c0_i32_1 = arith.constant 0 : i32
    return %c0_i32, %c0_i32_0 : i32, i32
  }
  func.func @transform_2(%arg0: i32) -> (i32, i32) {
    %c0_i32 = arith.constant 0 : i32
    %c0_i32_0 = arith.constant 0 : i32
    %c0_i32_1 = arith.constant 0 : i32
    return %c0_i32, %c0_i32_0 : i32, i32
  }
  func.func @transform_3(%arg0: i32) -> (i32, i32) {
    %c0_i32 = arith.constant 0 : i32
    %c0_i32_0 = arith.constant 0 : i32
    %c0_i32_1 = arith.constant 0 : i32
    return %c0_i32, %c0_i32_0 : i32, i32
  }
  func.func @transform_4(%arg0: i32) -> (i32, i32) {
    %c0_i32 = arith.constant 0 : i32
    %c0_i32_0 = arith.constant 0 : i32
    %c0_i32_1 = arith.constant 0 : i32
    return %c0_i32, %c0_i32_0 : i32, i32
  }
  func.func @transform_5(%arg0: i32) -> (i32, i32) {
    %c0_i32 = arith.constant 0 : i32
    %c0_i32_0 = arith.constant 0 : i32
    return %arg0, %c0_i32 : i32, i32
  }
}

</mosaic_0001>

<bundles_post_ra>
// kernel: encoder_forward.1
= control target key start
LH: loop header
LB: loop body
LE: loop exit
PB: predicated region body
PF: predicated region fallthrough
CT: control target
= control target key end

     0   :  { %v50_v28 = vlaneseq  ;;  %v5910_v36 = vmov 1983009808   ;;  %s7237_s0 = inlined_call_operand.vmem [shape: f32[2,6144], index: 0, kind: input, shape index: {}]   ;;  %s7238_s1 = inlined_call_operand.vmem [shape: bf16[6144,128], index: 1, kind: input, shape index: {}]   ;;  %s7239_s2 = inlined_call_operand.vmem [shape: f32[1,128], index: 2, kind: input, shape index: {}]   ;;  %s7240_s3 = inlined_call_operand.vmem [shape: f32[128,32], index: 3, kind: input, shape index: {}]   ;;  %s7241_s4 = inlined_call_operand.vmem [shape: f32[1,32], index: 4, kind: input, shape index: {}]   ;;  %s7242_s5 = inlined_call_operand.hbm [shape: f32[2,32], index: 5, kind: output, shape index: {}]  }
   0x1   :  { %v5490_v0 = vld [vmem:[%s7238_s1 + $0x40] sm:$0xff]   ;;  %v5494_v4 = vld [vmem:[%s7238_s1 + $0x48] sm:$0xff]   ;;  %v5498_v8 = vld [vmem:[%s7238_s1 + $0x50] sm:$0xff]   ;;  %v48_v37 = vunpack.c.l.s4 %v5910_v36 }
   0x2   :  { %v5491_v1 = vld [vmem:[%s7238_s1 + $0xc0] sm:$0xff]   ;;  %4881 = vmatprep.subr.bf16.mxu0 %v5490_v0  ;;  %v5495_v5 = vld [vmem:[%s7238_s1 + $0xc8] sm:$0xff]   ;;  %v5499_v9 = vld [vmem:[%s7238_s1 + $0xd0] sm:$0xff]   ;;  %v51_v33 = vshrl.u32 %v50_v28, 7 }
   0x3   :  { %v5492_v2 = vld [vmem:[%s7238_s1] sm:$0xff]   ;;  %4903 = vmatprep.subr.bf16.mxu1 %v5491_v1  ;;  %v5496_v6 = vld [vmem:[%s7238_s1 + $0x8] sm:$0xff]   ;;  %v5500_v10 = vld [vmem:[%s7238_s1 + $0x10] sm:$0xff]   ;;  %v49_v39 = vunpack.c.0.s8 %v48_v37 }
   0x4   :  { %v5493_v3 = vld [vmem:[%s7238_s1 + $0x80] sm:$0xff]   ;;  %4882 = vmatpush3.bf16.msra.mxu0 %v5492_v2  ;;  %v5497_v7 = vld [vmem:[%s7238_s1 + $0x88] sm:$0xff]   ;;  %v5501_v11 = vld [vmem:[%s7238_s1 + $0x90] sm:$0xff]  }
   0x5   :  { %4904 = vmatpush3.bf16.msra.mxu1 %v5493_v3  ;;  %4883 = vmatprep.subr.bf16.mxu0 %v5494_v4  ;;  %v5502_v12 = vld [vmem:[%s7238_s1 + $0x58] sm:$0xff]   ;;  %v5506_v16 = vld [vmem:[%s7238_s1 + $0x60] sm:$0xff]   ;;  %v5510_v20 = vld [vmem:[%s7238_s1 + $0x68] sm:$0xff]   ;;  %v6050_v41 = vsub.s32 %v49_v39, %v51_v33 }
   0x6   :  { %4905 = vmatprep.subr.bf16.mxu1 %v5495_v5  ;;  %v5503_v13 = vld [vmem:[%s7238_s1 + $0xd8] sm:$0xff]   ;;  %v5507_v17 = vld [vmem:[%s7238_s1 + $0xe0] sm:$0xff]   ;;  %v5511_v21 = vld [vmem:[%s7238_s1 + $0xe8] sm:$0xff]  }
   0x7   :  { %v5504_v14 = vld [vmem:[%s7238_s1 + $0x18] sm:$0xff]   ;;  %v5508_v18 = vld [vmem:[%s7238_s1 + $0x20] sm:$0xff]   ;;  %v5512_v22 = vld [vmem:[%s7238_s1 + $0x28] sm:$0xff]  }
   0x8   :  { %4884 = vmatpush3.bf16.msra.mxu0 %v5496_v6  ;;  %v5505_v15 = vld [vmem:[%s7238_s1 + $0x98] sm:$0xff]   ;;  %v5509_v19 = vld [vmem:[%s7238_s1 + $0xa0] sm:$0xff]   ;;  %v5513_v23 = vld [vmem:[%s7238_s1 + $0xa8] sm:$0xff]  }
   0x9   :  { %4906 = vmatpush3.bf16.msra.mxu1 %v5497_v7  ;;  %4885 = vmatprep.subr.bf16.mxu0 %v5498_v8  ;;  %v5514_v24 = vld [vmem:[%s7238_s1 + $0x70] sm:$0xff]   ;;  %v5518_v29 = vld [vmem:[%s7238_s1 + $0x78] sm:$0xff]   ;;  %v22_v34 = vld [vmem:[%s7237_s0] sm:$0xff] }
   0xa   :  { %4907 = vmatprep.subr.bf16.mxu1 %v5499_v9  ;;  %v5515_v25 = vld [vmem:[%s7238_s1 + $0xf0] sm:$0xff]   ;;  %v5519_v30 = vld [vmem:[%s7238_s1 + $0xf8] sm:$0xff]   ;;  %v5523_v35 = vld [vmem:[%s7238_s1 + $0x140] sm:$0xff]   ;;  %v46_v40 = vcombine.high %v22_v34, %v22_v34  ;;  %v53_v42 = vrot.slane %v22_v34, %v6050_v41 }
   0xb   :  { %v5516_v26 = vld [vmem:[%s7238_s1 + $0x30] sm:$0xff]   ;;  %v5520_v31 = vld [vmem:[%s7238_s1 + $0x38] sm:$0xff]   ;;  %v5524_v38 = vld [vmem:[%s7238_s1 + $0x1c0] sm:$0xff]  }
   0xc   :  { %4886 = vmatpush3.bf16.msra.mxu0 %v5500_v10  ;;  %v5517_v27 = vld [vmem:[%s7238_s1 + $0xb0] sm:$0xff]   ;;  %v5521_v32 = vld [vmem:[%s7238_s1 + $0xb8] sm:$0xff]   ;;  %v60_v43 = vrot.slane %v46_v40, %v6050_v41  ;;  %v61_v44 = vcombine.high %v53_v42, %v53_v42  ;;  %v5525_v46 = vld [vmem:[%s7238_s1 + $0x100] sm:$0xff]   ;;  %v298_v47 = vpack.c.bf16 %v53_v42, %v53_v42 }
   0xd   :  { %4908 = vmatpush3.bf16.msra.mxu1 %v5501_v11  ;;  %4887 = vmatprep.subr.bf16.mxu0 %v5502_v12  ;;  %v5526_v49 = vld [vmem:[%s7238_s1 + $0x180] sm:$0xff]   ;;  %v5527_v52 = vld [vmem:[%s7238_s1 + $0x148] sm:$0xff]   ;;  %v5531_v56 = vld [vmem:[%s7238_s1 + $0x150] sm:$0xff]  }
   0xe   :  { %4909 = vmatprep.subr.bf16.mxu1 %v5503_v13  ;;  %v62_v45 = vcombine.high %v60_v43, %v60_v43  ;;  %v300_v48 = vpack.c.bf16 %v60_v43, %v60_v43  ;;  %v299_v50 = vpack.c.bf16 %v61_v44, %v61_v44  ;;  %v5528_v53 = vld [vmem:[%s7238_s1 + $0x1c8] sm:$0xff]   ;;  %v5532_v57 = vld [vmem:[%s7238_s1 + $0x1d0] sm:$0xff]   ;;  %v5535_v60 = vld [vmem:[%s7238_s1 + $0x158] sm:$0xff]  }
   0xf   :  { %v5529_v54 = vld [vmem:[%s7238_s1 + $0x108] sm:$0xff]   ;;  %v5533_v58 = vld [vmem:[%s7238_s1 + $0x110] sm:$0xff]   ;;  %v5536_v61 = vld [vmem:[%s7238_s1 + $0x1d8] sm:$0xff]  }
  0x10   :  { %4888 = vmatpush3.bf16.msra.mxu0 %v5504_v14  ;;  %v301_v51 = vpack.c.bf16 %v62_v45, %v62_v45  ;;  %3457 = vmatprep.mubr.bf16.mxu0 %v299_v50  ;;  %v5530_v55 = vld [vmem:[%s7238_s1 + $0x188] sm:$0xff]   ;;  %v5534_v59 = vld [vmem:[%s7238_s1 + $0x190] sm:$0xff]   ;;  %v5537_v62 = vld [vmem:[%s7238_s1 + $0x118] sm:$0xff]  }
  0x11   :  { %4910 = vmatpush3.bf16.msra.mxu1 %v5505_v15  ;;  %4889 = vmatprep.subr.bf16.mxu0 %v5506_v16  ;;  %v5538_v63 = vld [vmem:[%s7238_s1 + $0x198] sm:$0xff]   ;;  %v5539_v0 = vld [vmem:[%s7238_s1 + $0x160] sm:$0xff]   ;;  %v5543_v4 = vld [vmem:[%s7238_s1 + $0x168] sm:$0xff]  }
  0x12   :  { %4911 = vmatprep.subr.bf16.mxu1 %v5507_v17  ;;  %3497 = vmatprep.mubr.bf16.mxu1 %v301_v51  ;;  %v5540_v1 = vld [vmem:[%s7238_s1 + $0x1e0] sm:$0xff]   ;;  %v5544_v5 = vld [vmem:[%s7238_s1 + $0x1e8] sm:$0xff]   ;;  %v5547_v8 = vld [vmem:[%s7238_s1 + $0x170] sm:$0xff]  }
  0x13   :  { %v5541_v2 = vld [vmem:[%s7238_s1 + $0x120] sm:$0xff]   ;;  %v5545_v6 = vld [vmem:[%s7238_s1 + $0x128] sm:$0xff]   ;;  %v5548_v9 = vld [vmem:[%s7238_s1 + $0x1f0] sm:$0xff]  }
  0x14   :  { %4890 = vmatpush3.bf16.msra.mxu0 %v5508_v18  ;;  %v5542_v3 = vld [vmem:[%s7238_s1 + $0x1a0] sm:$0xff]   ;;  %v5546_v7 = vld [vmem:[%s7238_s1 + $0x1a8] sm:$0xff]   ;;  %v5549_v11 = vld [vmem:[%s7238_s1 + $0x130] sm:$0xff]  }
  0x15   :  { %4912 = vmatpush3.bf16.msra.mxu1 %v5509_v19  ;;  %4891 = vmatprep.subr.bf16.mxu0 %v5510_v20  ;;  %v23_v10 = vld [vmem:[%s7237_s0 + $0x8] sm:$0xff]  ;;  %v5550_v14 = vld [vmem:[%s7238_s1 + $0x1b0] sm:$0xff]   ;;  %v5551_v15 = vld [vmem:[%s7238_s1 + $0x178] sm:$0xff]  }
  0x16   :  { %4913 = vmatprep.subr.bf16.mxu1 %v5511_v21  ;;  %v70_v12 = vrot.slane %v23_v10, %v6050_v41  ;;  %v63_v13 = vcombine.high %v23_v10, %v23_v10  ;;  %v5552_v18 = vld [vmem:[%s7238_s1 + $0x1f8] sm:$0xff]   ;;  %v5563_v33 = vld [vmem:[%s7238_s1 + $0x288] sm:$0xff]   ;;  %v5564_v34 = vld [vmem:[%s7238_s1 + $0x250] sm:$0xff]  }
  0x17   :  { %v5553_v19 = vld [vmem:[%s7238_s1 + $0x138] sm:$0xff]   ;;  %v5566_v36 = vld [vmem:[%s7238_s1 + $0x210] sm:$0xff]   ;;  %v5572_v43 = vld [vmem:[%s7238_s1 + $0x260] sm:$0xff]  }
  0x18   :  { %4892 = vmatpush3.bf16.msra.mxu0 %v5512_v22  ;;  %v78_v16 = vcombine.high %v70_v12, %v70_v12  ;;  %v77_v17 = vrot.slane %v63_v13, %v6050_v41  ;;  %v5554_v22 = vld [vmem:[%s7238_s1 + $0x1b8] sm:$0xff]   ;;  %v5567_v37 = vld [vmem:[%s7238_s1 + $0x290] sm:$0xff]   ;;  %v5573_v44 = vld [vmem:[%s7238_s1 + $0x2e0] sm:$0xff]  }
  0x19   :  { %4914 = vmatpush3.bf16.msra.mxu1 %v5513_v23  ;;  %4893 = vmatprep.subr.bf16.mxu0 %v5514_v24  ;;  %v5556_v24 = vld [vmem:[%s7238_s1 + $0x240] sm:$0xff]   ;;  %v5569_v39 = vld [vmem:[%s7238_s1 + $0x2d8] sm:$0xff]   ;;  %v5579_v50 = vld [vmem:[%s7238_s1 + $0x2a8] sm:$0xff]  }
  0x1a   :  { %4915 = vmatprep.subr.bf16.mxu1 %v5515_v25  ;;  %v303_v20 = vpack.c.bf16 %v78_v16, %v78_v16  ;;  %v79_v21 = vcombine.high %v77_v17, %v77_v17  ;;  %v5557_v25 = vld [vmem:[%s7238_s1 + $0x2c0] sm:$0xff]   ;;  %v304_v28 = vpack.c.bf16 %v77_v17, %v77_v17  ;;  %v5570_v40 = vld [vmem:[%s7238_s1 + $0x218] sm:$0xff]   ;;  %v5580_v51 = vld [vmem:[%s7238_s1 + $0x270] sm:$0xff]  }
  0x1b   :  { %v5571_v42 = vld [vmem:[%s7238_s1 + $0x298] sm:$0xff]   ;;  %v5574_v45 = vld [vmem:[%s7238_s1 + $0x220] sm:$0xff]   ;;  %v5594_v10 = vld [vmem:[%s7238_s1 + $0x3c8] sm:$0xff]  }
  0x1c   :  { %4894 = vmatpush3.bf16.msra.mxu0 %v5516_v26  ;;  %v305_v23 = vpack.c.bf16 %v79_v21, %v79_v21  ;;  %v5558_v26 = vld [vmem:[%s7238_s1 + $0x200] sm:$0xff]   ;;  %v5597_v13 = vld [vmem:[%s7238_s1 + $0x350] sm:$0xff]   ;;  %v5601_v17 = vld [vmem:[%s7238_s1 + $0x358] sm:$0xff]  }
  0x1d   :  { %4916 = vmatpush3.bf16.msra.mxu1 %v5517_v27  ;;  %4895 = vmatprep.subr.bf16.mxu0 %v5518_v29  ;;  %v302_v27 = vpack.c.bf16 %v70_v12, %v70_v12  ;;  %v5559_v29 = vld [vmem:[%s7238_s1 + $0x280] sm:$0xff]   ;;  %v5596_v12 = vld [vmem:[%s7238_s1 + $0x388] sm:$0xff]   ;;  %v5600_v16 = vld [vmem:[%s7238_s1 + $0x390] sm:$0xff]  }
  0x1e   :  { %4917 = vmatprep.subr.bf16.mxu1 %v5519_v30  ;;  %v5560_v30 = vld [vmem:[%s7238_s1 + $0x248] sm:$0xff]   ;;  %v5605_v21 = vld [vmem:[%s7238_s1 + $0x360] sm:$0xff]  }
  0x20   :  { %4896 = vmatpush3.bf16.msra.mxu0 %v5520_v31  ;;  %v5561_v31 = vld [vmem:[%s7238_s1 + $0x2c8] sm:$0xff]  }
  0x21   :  { %4918 = vmatpush3.bf16.msra.mxu1 %v5521_v32  ;;  %4925 = vmatprep.subr.bf16.mxu0 %v5523_v35  ;;  %v5562_v32 = vld [vmem:[%s7238_s1 + $0x208] sm:$0xff]   ;;  %v5565_v35 = vld [vmem:[%s7238_s1 + $0x2d0] sm:$0xff]  }
  0x22   :  { %4947 = vmatprep.subr.bf16.mxu1 %v5524_v38  ;;  %v5568_v38 = vld [vmem:[%s7238_s1 + $0x258] sm:$0xff]  }
  0x23   :  { %3458 = vmatmul.mubr.bf16.vlgmr.msra.gmra.mrb[0].mxu0 %v298_v47  ;;  %v5576_v47 = vld [vmem:[%s7238_s1 + $0x268] sm:$0xff]  }
  0x24   :  { %3498 = vmatmul.mubr.bf16.vlgmr.msra.gmra.mrb[0].mxu1 %v300_v48  ;;  %4926 = vmatpush3.bf16.msra.mxu0 %v5525_v46  ;;  %v5575_v46 = vld [vmem:[%s7238_s1 + $0x2a0] sm:$0xff]   ;;  %v5577_v48 = vld [vmem:[%s7238_s1 + $0x2e8] sm:$0xff]  }
  0x25   :  { %4948 = vmatpush3.bf16.msra.mxu1 %v5526_v49  ;;  %4927 = vmatprep.subr.bf16.mxu0 %v5527_v52  ;;  %v5578_v49 = vld [vmem:[%s7238_s1 + $0x228] sm:$0xff]   ;;  %v5581_v52 = vld [vmem:[%s7238_s1 + $0x2f0] sm:$0xff]  }
  0x26   :  { %4949 = vmatprep.subr.bf16.mxu1 %v5528_v53  ;;  %3537 = vmatprep.mubr.bf16.mxu0 %v303_v20  ;;  %v24_v53 = vld [vmem:[%s7237_s0 + $0x10] sm:$0xff]  ;;  %v5604_v20 = vld [vmem:[%s7238_s1 + $0x398] sm:$0xff]  }
  0x27   :  { %3577 = vmatprep.mubr.bf16.mxu1 %v305_v23  ;;  %v5607_v23 = vld [vmem:[%s7238_s1 + $0x320] sm:$0xff]  }
  0x28   :  { %4928 = vmatpush3.bf16.msra.mxu0 %v5529_v54  ;;  %v5582_v54 = vld [vmem:[%s7238_s1 + $0x230] sm:$0xff]  }
  0x29   :  { %4950 = vmatpush3.bf16.msra.mxu1 %v5530_v55  ;;  %4929 = vmatprep.subr.bf16.mxu0 %v5531_v56  ;;  %v87_v55 = vrot.slane %v24_v53, %v6050_v41  ;;  %v80_v56 = vcombine.high %v24_v53, %v24_v53  ;;  %v5627_v53 = vld [vmem:[%s7238_s1 + $0x4c8] sm:$0xff]  }
  0x2a   :  { %4951 = vmatprep.subr.bf16.mxu1 %v5532_v57  ;;  %v5583_v57 = vld [vmem:[%s7238_s1 + $0x2b0] sm:$0xff]  }
  0x2c   :  { %4930 = vmatpush3.bf16.msra.mxu0 %v5533_v58  ;;  %v5584_v58 = vld [vmem:[%s7238_s1 + $0x278] sm:$0xff]  }
  0x2d   :  { %4952 = vmatpush3.bf16.msra.mxu1 %v5534_v59  ;;  %4931 = vmatprep.subr.bf16.mxu0 %v5535_v60  ;;  %v95_v59 = vcombine.high %v87_v55, %v87_v55  ;;  %v94_v60 = vrot.slane %v80_v56, %v6050_v41  ;;  %v5630_v56 = vld [vmem:[%s7238_s1 + $0x450] sm:$0xff]  }
  0x2e   :  { %4953 = vmatprep.subr.bf16.mxu1 %v5536_v61  ;;  %v5585_v61 = vld [vmem:[%s7238_s1 + $0x2f8] sm:$0xff]  }
  0x30   :  { %4932 = vmatpush3.bf16.msra.mxu0 %v5537_v62  ;;  %v5586_v62 = vld [vmem:[%s7238_s1 + $0x238] sm:$0xff]  }
  0x31   :  { %4954 = vmatpush3.bf16.msra.mxu1 %v5538_v63  ;;  %4933 = vmatprep.subr.bf16.mxu0 %v5539_v0  ;;  %v307_v63 = vpack.c.bf16 %v95_v59, %v95_v59  ;;  %v96_v0 = vcombine.high %v94_v60, %v94_v60  ;;  %v5633_v59 = vld [vmem:[%s7238_s1 + $0x490] sm:$0xff]  }
  0x32   :  { %4955 = vmatprep.subr.bf16.mxu1 %v5540_v1  ;;  %v5587_v1 = vld [vmem:[%s7238_s1 + $0x2b8] sm:$0xff]  }
  0x34   :  { %4934 = vmatpush3.bf16.msra.mxu0 %v5541_v2  ;;  %v309_v2 = vpack.c.bf16 %v96_v0, %v96_v0  ;;  %v5638_v0 = vld [vmem:[%s7238_s1 + $0x460] sm:$0xff]  }
  0x35   :  { %4956 = vmatpush3.bf16.msra.mxu1 %v5542_v3  ;;  %4935 = vmatprep.subr.bf16.mxu0 %v5543_v4  ;;  %v5589_v3 = vld [vmem:[%s7238_s1 + $0x340] sm:$0xff]  }
  0x36   :  { %4957 = vmatprep.subr.bf16.mxu1 %v5544_v5  ;;  %v5590_v4 = vld [vmem:[%s7238_s1 + $0x3c0] sm:$0xff]  }
  0x37   :  { %v5591_v5 = vld [vmem:[%s7238_s1 + $0x300] sm:$0xff]  }
  0x38   :  { %4936 = vmatpush3.bf16.msra.mxu0 %v5545_v6  ;;  %v306_v6 = vpack.c.bf16 %v87_v55, %v87_v55  ;;  %v5629_v55 = vld [vmem:[%s7238_s1 + $0x488] sm:$0xff]  }
  0x39   :  { %4958 = vmatpush3.bf16.msra.mxu1 %v5546_v7  ;;  %4937 = vmatprep.subr.bf16.mxu0 %v5547_v8  ;;  %v308_v7 = vpack.c.bf16 %v94_v60, %v94_v60  ;;  %v5592_v8 = vld [vmem:[%s7238_s1 + $0x380] sm:$0xff]   ;;  %v5634_v60 = vld [vmem:[%s7238_s1 + $0x458] sm:$0xff]  }
  0x3a   :  { %4959 = vmatprep.subr.bf16.mxu1 %v5548_v9  ;;  %v5593_v9 = vld [vmem:[%s7238_s1 + $0x348] sm:$0xff]  }
  0x3c   :  { %4938 = vmatpush3.bf16.msra.mxu0 %v5549_v11  ;;  %v5595_v11 = vld [vmem:[%s7238_s1 + $0x308] sm:$0xff]  }
  0x3d   :  { %4960 = vmatpush3.bf16.msra.mxu1 %v5550_v14  ;;  %4939 = vmatprep.subr.bf16.mxu0 %v5551_v15  ;;  %v5598_v14 = vld [vmem:[%s7238_s1 + $0x3d0] sm:$0xff]  }
  0x3e   :  { %4961 = vmatprep.subr.bf16.mxu1 %v5552_v18  ;;  %v5599_v15 = vld [vmem:[%s7238_s1 + $0x310] sm:$0xff]   ;;  %v5602_v18 = vld [vmem:[%s7238_s1 + $0x3d8] sm:$0xff]  }
  0x40   :  { %4940 = vmatpush3.bf16.msra.mxu0 %v5553_v19  ;;  %v5603_v19 = vld [vmem:[%s7238_s1 + $0x318] sm:$0xff]  }
  0x41   :  { %4962 = vmatpush3.bf16.msra.mxu1 %v5554_v22  ;;  %4969 = vmatprep.subr.bf16.mxu0 %v5556_v24  ;;  %v5606_v22 = vld [vmem:[%s7238_s1 + $0x3e0] sm:$0xff]  }
  0x42   :  { %4991 = vmatprep.subr.bf16.mxu1 %v5557_v25  ;;  %v5608_v24 = vld [vmem:[%s7238_s1 + $0x3a0] sm:$0xff]   ;;  %v5609_v25 = vld [vmem:[%s7238_s1 + $0x368] sm:$0xff]  }
  0x43   :  { %3538 = vmatmul.mubr.bf16.vlgmr.msra.gmra.mrb[4].mxu0 %v302_v27  ;;  %v5611_v27 = vld [vmem:[%s7238_s1 + $0x328] sm:$0xff]  }
  0x44   :  { %3578 = vmatmul.mubr.bf16.vlgmr.msra.gmra.mrb[4].mxu1 %v304_v28  ;;  %4970 = vmatpush3.bf16.msra.mxu0 %v5558_v26  ;;  %v5610_v26 = vld [vmem:[%s7238_s1 + $0x3e8] sm:$0xff]  }
  0x45   :  { %4992 = vmatpush3.bf16.msra.mxu1 %v5559_v29  ;;  %4971 = vmatprep.subr.bf16.mxu0 %v5560_v30  ;;  %v5612_v28 = vld [vmem:[%s7238_s1 + $0x3a8] sm:$0xff]   ;;  %v5613_v29 = vld [vmem:[%s7238_s1 + $0x370] sm:$0xff]  }
  0x46   :  { %4993 = vmatprep.subr.bf16.mxu1 %v5561_v31  ;;  %3617 = vmatprep.mubr.bf16.mxu0 %v307_v63  ;;  %v5614_v30 = vld [vmem:[%s7238_s1 + $0x3f0] sm:$0xff]   ;;  %v5637_v63 = vld [vmem:[%s7238_s1 + $0x498] sm:$0xff]  }
  0x47   :  { %3657 = vmatprep.mubr.bf16.mxu1 %v309_v2  ;;  %v5615_v31 = vld [vmem:[%s7238_s1 + $0x330] sm:$0xff]   ;;  %v5640_v2 = vld [vmem:[%s7238_s1 + $0x420] sm:$0xff]  }
  0x48   :  { %4972 = vmatpush3.bf16.msra.mxu0 %v5562_v32  ;;  %v25_v32 = vld [vmem:[%s7237_s0 + $0x18] sm:$0xff] }
  0x49   :  { %4994 = vmatpush3.bf16.msra.mxu1 %v5563_v33  ;;  %4973 = vmatprep.subr.bf16.mxu0 %v5564_v34  ;;  %v5616_v33 = vld [vmem:[%s7238_s1 + $0x3b0] sm:$0xff]   ;;  %v104_v34 = vrot.slane %v25_v32, %v6050_v41 }
  0x4a   :  { %4995 = vmatprep.subr.bf16.mxu1 %v5565_v35  ;;  %v97_v35 = vcombine.high %v25_v32, %v25_v32  ;;  %v5661_v32 = vld [vmem:[%s7238_s1 + $0x508] sm:$0xff]  }
  0x4c   :  { %4974 = vmatpush3.bf16.msra.mxu0 %v5566_v36  ;;  %v5617_v36 = vld [vmem:[%s7238_s1 + $0x378] sm:$0xff]  }
  0x4d   :  { %4996 = vmatpush3.bf16.msra.mxu1 %v5567_v37  ;;  %4975 = vmatprep.subr.bf16.mxu0 %v5568_v38  ;;  %v5618_v37 = vld [vmem:[%s7238_s1 + $0x3f8] sm:$0xff]   ;;  %v112_v38 = vcombine.high %v104_v34, %v104_v34 }
  0x4e   :  { %4997 = vmatprep.subr.bf16.mxu1 %v5569_v39  ;;  %v111_v39 = vrot.slane %v97_v35, %v6050_v41  ;;  %v5664_v35 = vld [vmem:[%s7238_s1 + $0x5d0] sm:$0xff]  }
  0x50   :  { %4976 = vmatpush3.bf16.msra.mxu0 %v5570_v40  ;;  %v5619_v40 = vld [vmem:[%s7238_s1 + $0x338] sm:$0xff]  }
  0x51   :  { %4998 = vmatpush3.bf16.msra.mxu1 %v5571_v42  ;;  %4977 = vmatprep.subr.bf16.mxu0 %v5572_v43  ;;  %v5620_v42 = vld [vmem:[%s7238_s1 + $0x3b8] sm:$0xff]   ;;  %v311_v43 = vpack.c.bf16 %v112_v38, %v112_v38 }
  0x52   :  { %4999 = vmatprep.subr.bf16.mxu1 %v5573_v44  ;;  %v113_v44 = vcombine.high %v111_v39, %v111_v39  ;;  %v5667_v38 = vld [vmem:[%s7238_s1 + $0x558] sm:$0xff]  }
  0x54   :  { %4978 = vmatpush3.bf16.msra.mxu0 %v5574_v45  ;;  %v5622_v45 = vld [vmem:[%s7238_s1 + $0x440] sm:$0xff]  }
  0x55   :  { %5000 = vmatpush3.bf16.msra.mxu1 %v5575_v46  ;;  %4979 = vmatprep.subr.bf16.mxu0 %v5576_v47  ;;  %v313_v46 = vpack.c.bf16 %v113_v44, %v113_v44  ;;  %v5623_v47 = vld [vmem:[%s7238_s1 + $0x4c0] sm:$0xff]  }
  0x56   :  { %5001 = vmatprep.subr.bf16.mxu1 %v5577_v48  ;;  %v5624_v48 = vld [vmem:[%s7238_s1 + $0x400] sm:$0xff]  }
  0x57   :  { %v5672_v44 = vld [vmem:[%s7238_s1 + $0x5e0] sm:$0xff]  }
  0x58   :  { %4980 = vmatpush3.bf16.msra.mxu0 %v5578_v49  ;;  %v310_v49 = vpack.c.bf16 %v104_v34, %v104_v34  ;;  %v5663_v34 = vld [vmem:[%s7238_s1 + $0x550] sm:$0xff]  }
  0x59   :  { %5002 = vmatpush3.bf16.msra.mxu1 %v5579_v50  ;;  %4981 = vmatprep.subr.bf16.mxu0 %v5580_v51  ;;  %v312_v50 = vpack.c.bf16 %v111_v39, %v111_v39  ;;  %v5625_v51 = vld [vmem:[%s7238_s1 + $0x480] sm:$0xff]   ;;  %v5668_v39 = vld [vmem:[%s7238_s1 + $0x5d8] sm:$0xff]  }
  0x5a   :  { %5003 = vmatprep.subr.bf16.mxu1 %v5581_v52  ;;  %v5626_v52 = vld [vmem:[%s7238_s1 + $0x448] sm:$0xff]  }
  0x5c   :  { %4982 = vmatpush3.bf16.msra.mxu0 %v5582_v54  ;;  %v5628_v54 = vld [vmem:[%s7238_s1 + $0x408] sm:$0xff]  }
  0x5d   :  { %5004 = vmatpush3.bf16.msra.mxu1 %v5583_v57  ;;  %4983 = vmatprep.subr.bf16.mxu0 %v5584_v58  ;;  %v5631_v57 = vld [vmem:[%s7238_s1 + $0x4d0] sm:$0xff]  }
  0x5e   :  { %5005 = vmatprep.subr.bf16.mxu1 %v5585_v61  ;;  %v5632_v58 = vld [vmem:[%s7238_s1 + $0x410] sm:$0xff]   ;;  %v5635_v61 = vld [vmem:[%s7238_s1 + $0x4d8] sm:$0xff]  }
  0x60   :  { %4984 = vmatpush3.bf16.msra.mxu0 %v5586_v62  ;;  %v5636_v62 = vld [vmem:[%s7238_s1 + $0x418] sm:$0xff]  }
  0x61   :  { %5006 = vmatpush3.bf16.msra.mxu1 %v5587_v1  ;;  %5013 = vmatprep.subr.bf16.mxu0 %v5589_v3  ;;  %v5639_v1 = vld [vmem:[%s7238_s1 + $0x4e0] sm:$0xff]  }
  0x62   :  { %5035 = vmatprep.subr.bf16.mxu1 %v5590_v4  ;;  %v5641_v3 = vld [vmem:[%s7238_s1 + $0x4a0] sm:$0xff]   ;;  %v5642_v4 = vld [vmem:[%s7238_s1 + $0x468] sm:$0xff]  }
  0x63   :  { %3618 = vmatmul.mubr.bf16.vlgmr.msra.gmra.mrb[8].mxu0 %v306_v6  ;;  %v5644_v6 = vld [vmem:[%s7238_s1 + $0x428] sm:$0xff]  }
  0x64   :  { %3658 = vmatmul.mubr.bf16.vlgmr.msra.gmra.mrb[8].mxu1 %v308_v7  ;;  %5014 = vmatpush3.bf16.msra.mxu0 %v5591_v5  ;;  %v5643_v5 = vld [vmem:[%s7238_s1 + $0x4e8] sm:$0xff]  }
  0x65   :  { %5036 = vmatpush3.bf16.msra.mxu1 %v5592_v8  ;;  %5015 = vmatprep.subr.bf16.mxu0 %v5593_v9  ;;  %v5645_v7 = vld [vmem:[%s7238_s1 + $0x4a8] sm:$0xff]   ;;  %v5646_v8 = vld [vmem:[%s7238_s1 + $0x470] sm:$0xff]  }
  0x66   :  { %5037 = vmatprep.subr.bf16.mxu1 %v5594_v10  ;;  %3697 = vmatprep.mubr.bf16.mxu0 %v311_v43  ;;  %v5647_v9 = vld [vmem:[%s7238_s1 + $0x4f0] sm:$0xff]   ;;  %v5671_v43 = vld [vmem:[%s7238_s1 + $0x560] sm:$0xff]  }
  0x67   :  { %3737 = vmatprep.mubr.bf16.mxu1 %v313_v46  ;;  %v5648_v10 = vld [vmem:[%s7238_s1 + $0x430] sm:$0xff]   ;;  %v5674_v46 = vld [vmem:[%s7238_s1 + $0x5a0] sm:$0xff]  }
  0x68   :  { %5016 = vmatpush3.bf16.msra.mxu0 %v5595_v11  ;;  %v26_v11 = vld [vmem:[%s7237_s0 + $0x20] sm:$0xff] }
  0x69   :  { %5038 = vmatpush3.bf16.msra.mxu1 %v5596_v12  ;;  %5017 = vmatprep.subr.bf16.mxu0 %v5597_v13  ;;  %v5649_v12 = vld [vmem:[%s7238_s1 + $0x4b0] sm:$0xff]   ;;  %v121_v13 = vrot.slane %v26_v11, %v6050_v41 }
  0x6a   :  { %5039 = vmatprep.subr.bf16.mxu1 %v5598_v14  ;;  %v114_v14 = vcombine.high %v26_v11, %v26_v11  ;;  %v5694_v11 = vld [vmem:[%s7238_s1 + $0x608] sm:$0xff]  }
  0x6c   :  { %5018 = vmatpush3.bf16.msra.mxu0 %v5599_v15  ;;  %v5650_v15 = vld [vmem:[%s7238_s1 + $0x478] sm:$0xff]  }
  0x6d   :  { %5040 = vmatpush3.bf16.msra.mxu1 %v5600_v16  ;;  %5019 = vmatprep.subr.bf16.mxu0 %v5601_v17  ;;  %v5651_v16 = vld [vmem:[%s7238_s1 + $0x4f8] sm:$0xff]   ;;  %v129_v17 = vcombine.high %v121_v13, %v121_v13 }
  0x6e   :  { %5041 = vmatprep.subr.bf16.mxu1 %v5602_v18  ;;  %v128_v18 = vrot.slane %v114_v14, %v6050_v41  ;;  %v5697_v14 = vld [vmem:[%s7238_s1 + $0x6d0] sm:$0xff]  }
  0x70   :  { %5020 = vmatpush3.bf16.msra.mxu0 %v5603_v19  ;;  %v5652_v19 = vld [vmem:[%s7238_s1 + $0x438] sm:$0xff]  }
  0x71   :  { %5042 = vmatpush3.bf16.msra.mxu1 %v5604_v20  ;;  %5021 = vmatprep.subr.bf16.mxu0 %v5605_v21  ;;  %v5653_v20 = vld [vmem:[%s7238_s1 + $0x4b8] sm:$0xff]   ;;  %v315_v21 = vpack.c.bf16 %v129_v17, %v129_v17 }
  0x72   :  { %5043 = vmatprep.subr.bf16.mxu1 %v5606_v22  ;;  %v130_v22 = vcombine.high %v128_v18, %v128_v18  ;;  %v5700_v17 = vld [vmem:[%s7238_s1 + $0x658] sm:$0xff]  }
  0x74   :  { %5022 = vmatpush3.bf16.msra.mxu0 %v5607_v23  ;;  %v5655_v23 = vld [vmem:[%s7238_s1 + $0x540] sm:$0xff]  }
  0x75   :  { %5044 = vmatpush3.bf16.msra.mxu1 %v5608_v24  ;;  %5023 = vmatprep.subr.bf16.mxu0 %v5609_v25  ;;  %v317_v24 = vpack.c.bf16 %v130_v22, %v130_v22  ;;  %v5656_v25 = vld [vmem:[%s7238_s1 + $0x5c0] sm:$0xff]  }
  0x76   :  { %5045 = vmatprep.subr.bf16.mxu1 %v5610_v26  ;;  %v5657_v26 = vld [vmem:[%s7238_s1 + $0x500] sm:$0xff]  }
  0x77   :  { %v5705_v22 = vld [vmem:[%s7238_s1 + $0x6e0] sm:$0xff]  }
  0x78   :  { %5024 = vmatpush3.bf16.msra.mxu0 %v5611_v27  ;;  %v314_v27 = vpack.c.bf16 %v121_v13, %v121_v13  ;;  %v5696_v13 = vld [vmem:[%s7238_s1 + $0x650] sm:$0xff]  }
  0x79   :  { %5046 = vmatpush3.bf16.msra.mxu1 %v5612_v28  ;;  %5025 = vmatprep.subr.bf16.mxu0 %v5613_v29  ;;  %v316_v28 = vpack.c.bf16 %v128_v18, %v128_v18  ;;  %v5658_v29 = vld [vmem:[%s7238_s1 + $0x580] sm:$0xff]   ;;  %v5701_v18 = vld [vmem:[%s7238_s1 + $0x6d8] sm:$0xff]  }
  0x7a   :  { %5047 = vmatprep.subr.bf16.mxu1 %v5614_v30  ;;  %v5659_v30 = vld [vmem:[%s7238_s1 + $0x548] sm:$0xff]  }
  0x7c   :  { %5026 = vmatpush3.bf16.msra.mxu0 %v5615_v31  ;;  %v5660_v31 = vld [vmem:[%s7238_s1 + $0x5c8] sm:$0xff]  }
  0x7d   :  { %5048 = vmatpush3.bf16.msra.mxu1 %v5616_v33  ;;  %5027 = vmatprep.subr.bf16.mxu0 %v5617_v36  ;;  %v5662_v33 = vld [vmem:[%s7238_s1 + $0x588] sm:$0xff]   ;;  %v5665_v36 = vld [vmem:[%s7238_s1 + $0x510] sm:$0xff]  }
  0x7e   :  { %5049 = vmatprep.subr.bf16.mxu1 %v5618_v37  ;;  %v5666_v37 = vld [vmem:[%s7238_s1 + $0x590] sm:$0xff]  }
  0x80   :  { %5028 = vmatpush3.bf16.msra.mxu0 %v5619_v40  ;;  %v5669_v40 = vld [vmem:[%s7238_s1 + $0x518] sm:$0xff]  }
  0x81   :  { %5050 = vmatpush3.bf16.msra.mxu1 %v5620_v42  ;;  %5057 = vmatprep.subr.bf16.mxu0 %v5622_v45  ;;  %v5670_v42 = vld [vmem:[%s7238_s1 + $0x598] sm:$0xff]   ;;  %v5673_v45 = vld [vmem:[%s7238_s1 + $0x520] sm:$0xff]  }
  0x82   :  { %5079 = vmatprep.subr.bf16.mxu1 %v5623_v47  ;;  %v5675_v47 = vld [vmem:[%s7238_s1 + $0x568] sm:$0xff]  }
  0x83   :  { %3698 = vmatmul.mubr.bf16.vlgmr.msra.gmra.mrb[12].mxu0 %v310_v49  ;;  %v5677_v49 = vld [vmem:[%s7238_s1 + $0x528] sm:$0xff]  }
  0x84   :  { %3738 = vmatmul.mubr.bf16.vlgmr.msra.gmra.mrb[12].mxu1 %v312_v50  ;;  %5058 = vmatpush3.bf16.msra.mxu0 %v5624_v48  ;;  %v5676_v48 = vld [vmem:[%s7238_s1 + $0x5e8] sm:$0xff]  }
  0x85   :  { %5080 = vmatpush3.bf16.msra.mxu1 %v5625_v51  ;;  %5059 = vmatprep.subr.bf16.mxu0 %v5626_v52  ;;  %v5678_v50 = vld [vmem:[%s7238_s1 + $0x5a8] sm:$0xff]   ;;  %v5679_v51 = vld [vmem:[%s7238_s1 + $0x570] sm:$0xff]  }
  0x86   :  { %5081 = vmatprep.subr.bf16.mxu1 %v5627_v53  ;;  %3777 = vmatprep.mubr.bf16.mxu0 %v315_v21  ;;  %v5680_v52 = vld [vmem:[%s7238_s1 + $0x5f0] sm:$0xff]   ;;  %v5704_v21 = vld [vmem:[%s7238_s1 + $0x660] sm:$0xff]  }
  0x87   :  { %3817 = vmatprep.mubr.bf16.mxu1 %v317_v24  ;;  %v5681_v53 = vld [vmem:[%s7238_s1 + $0x530] sm:$0xff]   ;;  %v5707_v24 = vld [vmem:[%s7238_s1 + $0x6a0] sm:$0xff]  }
  0x88   :  { %5060 = vmatpush3.bf16.msra.mxu0 %v5628_v54  ;;  %v27_v54 = vld [vmem:[%s7237_s0 + $0x28] sm:$0xff] }
  0x89   :  { %5082 = vmatpush3.bf16.msra.mxu1 %v5629_v55  ;;  %5061 = vmatprep.subr.bf16.mxu0 %v5630_v56  ;;  %v5682_v55 = vld [vmem:[%s7238_s1 + $0x5b0] sm:$0xff]   ;;  %v138_v56 = vrot.slane %v27_v54, %v6050_v41 }
  0x8a   :  { %5083 = vmatprep.subr.bf16.mxu1 %v5631_v57  ;;  %v131_v57 = vcombine.high %v27_v54, %v27_v54  ;;  %v5727_v54 = vld [vmem:[%s7238_s1 + $0x708] sm:$0xff]  }
  0x8c   :  { %5062 = vmatpush3.bf16.msra.mxu0 %v5632_v58  ;;  %v5683_v58 = vld [vmem:[%s7238_s1 + $0x578] sm:$0xff]  }
  0x8d   :  { %5084 = vmatpush3.bf16.msra.mxu1 %v5633_v59  ;;  %5063 = vmatprep.subr.bf16.mxu0 %v5634_v60  ;;  %v5684_v59 = vld [vmem:[%s7238_s1 + $0x5f8] sm:$0xff]   ;;  %v146_v60 = vcombine.high %v138_v56, %v138_v56 }
  0x8e   :  { %5085 = vmatprep.subr.bf16.mxu1 %v5635_v61  ;;  %v145_v61 = vrot.slane %v131_v57, %v6050_v41  ;;  %v5730_v57 = vld [vmem:[%s7238_s1 + $0x7d0] sm:$0xff]  }
  0x90   :  { %5064 = vmatpush3.bf16.msra.mxu0 %v5636_v62  ;;  %v5685_v62 = vld [vmem:[%s7238_s1 + $0x538] sm:$0xff]  }
  0x91   :  { %5086 = vmatpush3.bf16.msra.mxu1 %v5637_v63  ;;  %5065 = vmatprep.subr.bf16.mxu0 %v5638_v0  ;;  %v5686_v63 = vld [vmem:[%s7238_s1 + $0x5b8] sm:$0xff]   ;;  %v319_v0 = vpack.c.bf16 %v146_v60, %v146_v60 }
  0x92   :  { %5087 = vmatprep.subr.bf16.mxu1 %v5639_v1  ;;  %v147_v1 = vcombine.high %v145_v61, %v145_v61  ;;  %v5733_v60 = vld [vmem:[%s7238_s1 + $0x758] sm:$0xff]  }
  0x94   :  { %5066 = vmatpush3.bf16.msra.mxu0 %v5640_v2  ;;  %v5688_v2 = vld [vmem:[%s7238_s1 + $0x640] sm:$0xff]  }
  0x95   :  { %5088 = vmatpush3.bf16.msra.mxu1 %v5641_v3  ;;  %5067 = vmatprep.subr.bf16.mxu0 %v5642_v4  ;;  %v321_v3 = vpack.c.bf16 %v147_v1, %v147_v1  ;;  %v5689_v4 = vld [vmem:[%s7238_s1 + $0x6c0] sm:$0xff]  }
  0x96   :  { %5089 = vmatprep.subr.bf16.mxu1 %v5643_v5  ;;  %v5690_v5 = vld [vmem:[%s7238_s1 + $0x600] sm:$0xff]  }
  0x97   :  { %v5738_v1 = vld [vmem:[%s7238_s1 + $0x7e0] sm:$0xff]  }
  0x98   :  { %5068 = vmatpush3.bf16.msra.mxu0 %v5644_v6  ;;  %v318_v6 = vpack.c.bf16 %v138_v56, %v138_v56  ;;  %v5729_v56 = vld [vmem:[%s7238_s1 + $0x750] sm:$0xff]  }
  0x99   :  { %5090 = vmatpush3.bf16.msra.mxu1 %v5645_v7  ;;  %5069 = vmatprep.subr.bf16.mxu0 %v5646_v8  ;;  %v320_v7 = vpack.c.bf16 %v145_v61, %v145_v61  ;;  %v5691_v8 = vld [vmem:[%s7238_s1 + $0x680] sm:$0xff]   ;;  %v5734_v61 = vld [vmem:[%s7238_s1 + $0x7d8] sm:$0xff]  }
  0x9a   :  { %5091 = vmatprep.subr.bf16.mxu1 %v5647_v9  ;;  %v5692_v9 = vld [vmem:[%s7238_s1 + $0x648] sm:$0xff]  }
  0x9c   :  { %5070 = vmatpush3.bf16.msra.mxu0 %v5648_v10  ;;  %v5693_v10 = vld [vmem:[%s7238_s1 + $0x6c8] sm:$0xff]  }
  0x9d   :  { %5092 = vmatpush3.bf16.msra.mxu1 %v5649_v12  ;;  %5071 = vmatprep.subr.bf16.mxu0 %v5650_v15  ;;  %v5695_v12 = vld [vmem:[%s7238_s1 + $0x688] sm:$0xff]   ;;  %v5698_v15 = vld [vmem:[%s7238_s1 + $0x610] sm:$0xff]  }
  0x9e   :  { %5093 = vmatprep.subr.bf16.mxu1 %v5651_v16  ;;  %v5699_v16 = vld [vmem:[%s7238_s1 + $0x690] sm:$0xff]  }
  0xa0   :  { %5072 = vmatpush3.bf16.msra.mxu0 %v5652_v19  ;;  %v5702_v19 = vld [vmem:[%s7238_s1 + $0x618] sm:$0xff]  }
  0xa1   :  { %5094 = vmatpush3.bf16.msra.mxu1 %v5653_v20  ;;  %5101 = vmatprep.subr.bf16.mxu0 %v5655_v23  ;;  %v5703_v20 = vld [vmem:[%s7238_s1 + $0x698] sm:$0xff]   ;;  %v5706_v23 = vld [vmem:[%s7238_s1 + $0x620] sm:$0xff]  }
  0xa2   :  { %5123 = vmatprep.subr.bf16.mxu1 %v5656_v25  ;;  %v5708_v25 = vld [vmem:[%s7238_s1 + $0x668] sm:$0xff]  }
  0xa3   :  { %3778 = vmatmul.mubr.bf16.vlgmr.msra.gmra.mrb[16].mxu0 %v314_v27  ;;  %v5710_v27 = vld [vmem:[%s7238_s1 + $0x628] sm:$0xff]  }
  0xa4   :  { %3818 = vmatmul.mubr.bf16.vlgmr.msra.gmra.mrb[16].mxu1 %v316_v28  ;;  %5102 = vmatpush3.bf16.msra.mxu0 %v5657_v26  ;;  %v5709_v26 = vld [vmem:[%s7238_s1 + $0x6e8] sm:$0xff]  }
  0xa5   :  { %5124 = vmatpush3.bf16.msra.mxu1 %v5658_v29  ;;  %5103 = vmatprep.subr.bf16.mxu0 %v5659_v30  ;;  %v5711_v28 = vld [vmem:[%s7238_s1 + $0x6a8] sm:$0xff]   ;;  %v5712_v29 = vld [vmem:[%s7238_s1 + $0x670] sm:$0xff]  }
  0xa6   :  { %5125 = vmatprep.subr.bf16.mxu1 %v5660_v31  ;;  %3857 = vmatprep.mubr.bf16.mxu0 %v319_v0  ;;  %v5713_v30 = vld [vmem:[%s7238_s1 + $0x6f0] sm:$0xff]   ;;  %v5737_v0 = vld [vmem:[%s7238_s1 + $0x760] sm:$0xff]  }
  0xa7   :  { %3897 = vmatprep.mubr.bf16.mxu1 %v321_v3  ;;  %v5714_v31 = vld [vmem:[%s7238_s1 + $0x630] sm:$0xff]   ;;  %v5740_v3 = vld [vmem:[%s7238_s1 + $0x7a0] sm:$0xff]  }
  0xa8   :  { %5104 = vmatpush3.bf16.msra.mxu0 %v5661_v32  ;;  %v5715_v32 = vld [vmem:[%s7238_s1 + $0x6b0] sm:$0xff]  }
  0xa9   :  { %5126 = vmatpush3.bf16.msra.mxu1 %v5662_v33  ;;  %5105 = vmatprep.subr.bf16.mxu0 %v5663_v34  ;;  %v28_v33 = vld [vmem:[%s7237_s0 + $0x30] sm:$0xff]  ;;  %v5716_v34 = vld [vmem:[%s7238_s1 + $0x678] sm:$0xff]  }
  0xaa   :  { %5127 = vmatprep.subr.bf16.mxu1 %v5664_v35  ;;  %v155_v35 = vrot.slane %v28_v33, %v6050_v41 }
  0xac   :  { %5106 = vmatpush3.bf16.msra.mxu0 %v5665_v36  ;;  %v148_v36 = vcombine.high %v28_v33, %v28_v33 }
  0xad   :  { %5128 = vmatpush3.bf16.msra.mxu1 %v5666_v37  ;;  %5107 = vmatprep.subr.bf16.mxu0 %v5667_v38  ;;  %v5717_v37 = vld [vmem:[%s7238_s1 + $0x6f8] sm:$0xff]  }
  0xae   :  { %5129 = vmatprep.subr.bf16.mxu1 %v5668_v39  ;;  %v5718_v38 = vld [vmem:[%s7238_s1 + $0x638] sm:$0xff]   ;;  %v163_v39 = vcombine.high %v155_v35, %v155_v35 }
  0xb0   :  { %5108 = vmatpush3.bf16.msra.mxu0 %v5669_v40  ;;  %v162_v40 = vrot.slane %v148_v36, %v6050_v41 }
  0xb1   :  { %5130 = vmatpush3.bf16.msra.mxu1 %v5670_v42  ;;  %5109 = vmatprep.subr.bf16.mxu0 %v5671_v43  ;;  %v5719_v42 = vld [vmem:[%s7238_s1 + $0x6b8] sm:$0xff]   ;;  %v323_v43 = vpack.c.bf16 %v163_v39, %v163_v39 }
  0xb2   :  { %5131 = vmatprep.subr.bf16.mxu1 %v5672_v44  ;;  %v164_v44 = vcombine.high %v162_v40, %v162_v40 }
  0xb4   :  { %5110 = vmatpush3.bf16.msra.mxu0 %v5673_v45  ;;  %v5721_v45 = vld [vmem:[%s7238_s1 + $0x740] sm:$0xff]  }
  0xb5   :  { %5132 = vmatpush3.bf16.msra.mxu1 %v5674_v46  ;;  %5111 = vmatprep.subr.bf16.mxu0 %v5675_v47  ;;  %v5722_v46 = vld [vmem:[%s7238_s1 + $0x7c0] sm:$0xff]   ;;  %v325_v47 = vpack.c.bf16 %v164_v44, %v164_v44  ;;  %v5758_v44 = vld [vmem:[%s7238_s1 + $0x848] sm:$0xff]  }
  0xb6   :  { %5133 = vmatprep.subr.bf16.mxu1 %v5676_v48  ;;  %v5723_v48 = vld [vmem:[%s7238_s1 + $0x700] sm:$0xff]  }
  0xb8   :  { %5112 = vmatpush3.bf16.msra.mxu0 %v5677_v49  ;;  %v322_v49 = vpack.c.bf16 %v155_v35, %v155_v35 }
  0xb9   :  { %5134 = vmatpush3.bf16.msra.mxu1 %v5678_v50  ;;  %5113 = vmatprep.subr.bf16.mxu0 %v5679_v51  ;;  %v324_v50 = vpack.c.bf16 %v162_v40, %v162_v40  ;;  %v5724_v51 = vld [vmem:[%s7238_s1 + $0x780] sm:$0xff]  }
  0xba   :  { %5135 = vmatprep.subr.bf16.mxu1 %v5680_v52  ;;  %v5725_v52 = vld [vmem:[%s7238_s1 + $0x748] sm:$0xff]  }
  0xbc   :  { %5114 = vmatpush3.bf16.msra.mxu0 %v5681_v53  ;;  %v5726_v53 = vld [vmem:[%s7238_s1 + $0x7c8] sm:$0xff]  }
  0xbd   :  { %5136 = vmatpush3.bf16.msra.mxu1 %v5682_v55  ;;  %5115 = vmatprep.subr.bf16.mxu0 %v5683_v58  ;;  %v5728_v55 = vld [vmem:[%s7238_s1 + $0x788] sm:$0xff]   ;;  %v5731_v58 = vld [vmem:[%s7238_s1 + $0x710] sm:$0xff]  }
  0xbe   :  { %5137 = vmatprep.subr.bf16.mxu1 %v5684_v59  ;;  %v5732_v59 = vld [vmem:[%s7238_s1 + $0x790] sm:$0xff]  }
  0xc0   :  { %5116 = vmatpush3.bf16.msra.mxu0 %v5685_v62  ;;  %v5735_v62 = vld [vmem:[%s7238_s1 + $0x718] sm:$0xff]  }
  0xc1   :  { %5138 = vmatpush3.bf16.msra.mxu1 %v5686_v63  ;;  %5145 = vmatprep.subr.bf16.mxu0 %v5688_v2  ;;  %v5736_v63 = vld [vmem:[%s7238_s1 + $0x798] sm:$0xff]   ;;  %v5739_v2 = vld [vmem:[%s7238_s1 + $0x720] sm:$0xff]  }
  0xc2   :  { %5167 = vmatprep.subr.bf16.mxu1 %v5689_v4  ;;  %v5741_v4 = vld [vmem:[%s7238_s1 + $0x768] sm:$0xff]  }
  0xc3   :  { %3858 = vmatmul.mubr.bf16.vlgmr.msra.gmra.mrb[20].mxu0 %v318_v6  ;;  %v5743_v6 = vld [vmem:[%s7238_s1 + $0x728] sm:$0xff]  }
  0xc4   :  { %3898 = vmatmul.mubr.bf16.vlgmr.msra.gmra.mrb[20].mxu1 %v320_v7  ;;  %5146 = vmatpush3.bf16.msra.mxu0 %v5690_v5  ;;  %v5742_v5 = vld [vmem:[%s7238_s1 + $0x7e8] sm:$0xff]  }
  0xc5   :  { %5168 = vmatpush3.bf16.msra.mxu1 %v5691_v8  ;;  %5147 = vmatprep.subr.bf16.mxu0 %v5692_v9  ;;  %v5744_v7 = vld [vmem:[%s7238_s1 + $0x7a8] sm:$0xff]   ;;  %v5745_v8 = vld [vmem:[%s7238_s1 + $0x770] sm:$0xff]   ;;  %v4495_v9 = vld [vmem:[%s7239_s2] ss:$0 sm:$0xff] }
  0xc6   :  { %5169 = vmatprep.subr.bf16.mxu1 %v5693_v10  ;;  %3937 = vmatprep.mubr.bf16.mxu0 %v323_v43  ;;  %v5746_v10 = vld [vmem:[%s7238_s1 + $0x7f0] sm:$0xff]   ;;  %v5757_v43 = vld [vmem:[%s7238_s1 + $0x880] sm:$0xff]  }
  0xc7   :  { %3977 = vmatprep.mubr.bf16.mxu1 %v325_v47  ;;  %v5761_v47 = vld [vmem:[%s7238_s1 + $0x888] sm:$0xff]  }
  0xc8   :  { %5148 = vmatpush3.bf16.msra.mxu0 %v5694_v11 }
  0xc9   :  { %5170 = vmatpush3.bf16.msra.mxu1 %v5695_v12  ;;  %5149 = vmatprep.subr.bf16.mxu0 %v5696_v13  ;;  %v5747_v13 = vld [vmem:[%s7238_s1 + $0x730] sm:$0xff]  }
  0xca   :  { %5171 = vmatprep.subr.bf16.mxu1 %v5697_v14  ;;  %v5748_v14 = vld [vmem:[%s7238_s1 + $0x7b0] sm:$0xff]  }
  0xcc   :  { %5150 = vmatpush3.bf16.msra.mxu0 %v5698_v15 }
  0xcd   :  { %5172 = vmatpush3.bf16.msra.mxu1 %v5699_v16  ;;  %5151 = vmatprep.subr.bf16.mxu0 %v5700_v17  ;;  %v5749_v17 = vld [vmem:[%s7238_s1 + $0x778] sm:$0xff]  }
  0xce   :  { %5173 = vmatprep.subr.bf16.mxu1 %v5701_v18 }
  0xd0   :  { %5152 = vmatpush3.bf16.msra.mxu0 %v5702_v19 }
  0xd1   :  { %5174 = vmatpush3.bf16.msra.mxu1 %v5703_v20  ;;  %5153 = vmatprep.subr.bf16.mxu0 %v5704_v21 }
  0xd2   :  { %5175 = vmatprep.subr.bf16.mxu1 %v5705_v22  ;;  %v5750_v22 = vld [vmem:[%s7238_s1 + $0x7f8] sm:$0xff]  }
  0xd4   :  { %5154 = vmatpush3.bf16.msra.mxu0 %v5706_v23  ;;  %v29_v23 = vld [vmem:[%s7237_s0 + $0x38] sm:$0xff] }
  0xd5   :  { %5176 = vmatpush3.bf16.msra.mxu1 %v5707_v24  ;;  %5155 = vmatprep.subr.bf16.mxu0 %v5708_v25 }
  0xd6   :  { %5177 = vmatprep.subr.bf16.mxu1 %v5709_v26  ;;  %v172_v26 = vrot.slane %v29_v23, %v6050_v41 }
  0xd8   :  { %5156 = vmatpush3.bf16.msra.mxu0 %v5710_v27  ;;  %v165_v27 = vcombine.high %v29_v23, %v29_v23  ;;  %v326_v40 = vpack.c.bf16 %v172_v26, %v172_v26 }
  0xd9   :  { %5178 = vmatpush3.bf16.msra.mxu1 %v5711_v28  ;;  %5157 = vmatprep.subr.bf16.mxu0 %v5712_v29  ;;  %v5751_v29 = vld [vmem:[%s7238_s1 + $0x738] sm:$0xff]  }
  0xda   :  { %5179 = vmatprep.subr.bf16.mxu1 %v5713_v30  ;;  %v5752_v30 = vld [vmem:[%s7238_s1 + $0x7b8] sm:$0xff]  }
  0xdc   :  { %5158 = vmatpush3.bf16.msra.mxu0 %v5714_v31  ;;  %v180_v31 = vcombine.high %v172_v26, %v172_v26  ;;  %v5788_v26 = vld [vmem:[%s7238_s1 + $0x9c0] sm:$0xff]  }
  0xdd   :  { %5180 = vmatpush3.bf16.msra.mxu1 %v5715_v32  ;;  %5159 = vmatprep.subr.bf16.mxu0 %v5716_v34  ;;  %v179_v32 = vrot.slane %v165_v27, %v6050_v41  ;;  %v5754_v34 = vld [vmem:[%s7238_s1 + $0x840] sm:$0xff]  }
  0xde   :  { %5181 = vmatprep.subr.bf16.mxu1 %v5717_v37  ;;  %v327_v35 = vpack.c.bf16 %v180_v31, %v180_v31  ;;  %v5755_v37 = vld [vmem:[%s7238_s1 + $0x8c0] sm:$0xff]  }
  0xdf   :  { %v181_v36 = vcombine.high %v179_v32, %v179_v32 }
  0xe0   :  { %5160 = vmatpush3.bf16.msra.mxu0 %v5718_v38  ;;  %v5756_v38 = vld [vmem:[%s7238_s1 + $0x800] sm:$0xff]  }
  0xe1   :  { %5182 = vmatpush3.bf16.msra.mxu1 %v5719_v42  ;;  %5189 = vmatprep.subr.bf16.mxu0 %v5721_v45  ;;  %v329_v39 = vpack.c.bf16 %v181_v36, %v181_v36  ;;  %v328_v42 = vpack.c.bf16 %v179_v32, %v179_v32  ;;  %v5759_v45 = vld [vmem:[%s7238_s1 + $0x8c8] sm:$0xff]   ;;  %v5790_v32 = vld [vmem:[%s7238_s1 + $0x980] sm:$0xff]  }
  0xe2   :  { %5211 = vmatprep.subr.bf16.mxu1 %v5722_v46  ;;  %v5760_v46 = vld [vmem:[%s7238_s1 + $0x808] sm:$0xff]  }
  0xe3   :  { %3938 = vmatmul.mubr.bf16.vlgmr.msra.gmra.mrb[24].mxu0 %v322_v49  ;;  %v5763_v49 = vld [vmem:[%s7238_s1 + $0x8d0] sm:$0xff]   ;;  %v5793_v36 = vld [vmem:[%s7238_s1 + $0x908] sm:$0xff]  }
  0xe4   :  { %3978 = vmatmul.mubr.bf16.vlgmr.msra.gmra.mrb[24].mxu1 %v324_v50  ;;  %5190 = vmatpush3.bf16.msra.mxu0 %v5723_v48  ;;  %v5762_v48 = vld [vmem:[%s7238_s1 + $0x850] sm:$0xff]  }
  0xe5   :  { %5212 = vmatpush3.bf16.msra.mxu1 %v5724_v51  ;;  %5191 = vmatprep.subr.bf16.mxu0 %v5725_v52  ;;  %v5764_v50 = vld [vmem:[%s7238_s1 + $0x810] sm:$0xff]   ;;  %v5766_v52 = vld [vmem:[%s7238_s1 + $0x858] sm:$0xff]  }
  0xe6   :  { %5213 = vmatprep.subr.bf16.mxu1 %v5726_v53  ;;  %4017 = vmatprep.mubr.bf16.mxu0 %v327_v35  ;;  %v5765_v51 = vld [vmem:[%s7238_s1 + $0x890] sm:$0xff]   ;;  %v5767_v53 = vld [vmem:[%s7238_s1 + $0x8d8] sm:$0xff]   ;;  %v5792_v35 = vld [vmem:[%s7238_s1 + $0x9c8] sm:$0xff]  }
  0xe7   :  { %4057 = vmatprep.mubr.bf16.mxu1 %v329_v39  ;;  %v5796_v39 = vld [vmem:[%s7238_s1 + $0x9d0] sm:$0xff]  }
  0xe8   :  { %5192 = vmatpush3.bf16.msra.mxu0 %v5727_v54  ;;  %v5768_v54 = vld [vmem:[%s7238_s1 + $0x818] sm:$0xff]  }
  0xe9   :  { %5214 = vmatpush3.bf16.msra.mxu1 %v5728_v55  ;;  %5193 = vmatprep.subr.bf16.mxu0 %v5729_v56  ;;  %v5769_v55 = vld [vmem:[%s7238_s1 + $0x898] sm:$0xff]   ;;  %v5770_v56 = vld [vmem:[%s7238_s1 + $0x860] sm:$0xff]  }
  0xea   :  { %5215 = vmatprep.subr.bf16.mxu1 %v5730_v57  ;;  %v5771_v57 = vld [vmem:[%s7238_s1 + $0x8e0] sm:$0xff]  }
  0xec   :  { %5194 = vmatpush3.bf16.msra.mxu0 %v5731_v58  ;;  %v5772_v58 = vld [vmem:[%s7238_s1 + $0x820] sm:$0xff]  }
  0xed   :  { %5216 = vmatpush3.bf16.msra.mxu1 %v5732_v59  ;;  %5195 = vmatprep.subr.bf16.mxu0 %v5733_v60  ;;  %v5773_v59 = vld [vmem:[%s7238_s1 + $0x8a0] sm:$0xff]   ;;  %v5774_v60 = vld [vmem:[%s7238_s1 + $0x868] sm:$0xff]  }
  0xee   :  { %5217 = vmatprep.subr.bf16.mxu1 %v5734_v61  ;;  %v5775_v61 = vld [vmem:[%s7238_s1 + $0x8e8] sm:$0xff]  }
  0xf0   :  { %5196 = vmatpush3.bf16.msra.mxu0 %v5735_v62  ;;  %v5776_v62 = vld [vmem:[%s7238_s1 + $0x828] sm:$0xff]  }
  0xf1   :  { %5218 = vmatpush3.bf16.msra.mxu1 %v5736_v63  ;;  %5197 = vmatprep.subr.bf16.mxu0 %v5737_v0  ;;  %v5777_v63 = vld [vmem:[%s7238_s1 + $0x8a8] sm:$0xff]   ;;  %v5778_v0 = vld [vmem:[%s7238_s1 + $0x870] sm:$0xff]  }
  0xf2   :  { %5219 = vmatprep.subr.bf16.mxu1 %v5738_v1  ;;  %v5779_v1 = vld [vmem:[%s7238_s1 + $0x8f0] sm:$0xff]  }
  0xf4   :  { %5198 = vmatpush3.bf16.msra.mxu0 %v5739_v2 }
  0xf5   :  { %5220 = vmatpush3.bf16.msra.mxu1 %v5740_v3  ;;  %5199 = vmatprep.subr.bf16.mxu0 %v5741_v4  ;;  %v5780_v4 = vld [vmem:[%s7238_s1 + $0x830] sm:$0xff]  }
  0xf6   :  { %5221 = vmatprep.subr.bf16.mxu1 %v5742_v5  ;;  %v4897_v11 = vpop.f32.mrb[0].mxu0  ;;  %v5781_v5 = vld [vmem:[%s7238_s1 + $0x8b0] sm:$0xff]  }
  0xf7   :  { %v4919_v12 = vpop.f32.mrb[0].mxu1  ;;  %v4898_v15 = vpop.f32.mrb[1].mxu0 }
  0xf8   :  { %v4920_v16 = vpop.f32.mrb[1].mxu1  ;;  %v4899_v18 = vadd.f32 %v4898_v15, %v4897_v11  ;;  %v4900_v20 = vpop.f32.mrb[2].mxu0  ;;  %5200 = vmatpush3.bf16.msra.mxu0 %v5743_v6  ;;  %v5783_v15 = vld [vmem:[%s7238_s1 + $0x8f8] sm:$0xff]  }
  0xf9   :  { %v4921_v19 = vadd.f32 %v4920_v16, %v4919_v12  ;;  %v4922_v21 = vpop.f32.mrb[2].mxu1  ;;  %5222 = vmatpush3.bf16.msra.mxu1 %v5744_v7  ;;  %v4901_v24 = vpop.f32.mrb[3].mxu0  ;;  %5201 = vmatprep.subr.bf16.mxu0 %v5745_v8  ;;  %v5782_v8 = vld [vmem:[%s7238_s1 + $0x878] sm:$0xff]   ;;  %v30_v16 = vld [vmem:[%s7237_s0 + $0x40] sm:$0xff] }
  0xfa   :  { %v4923_v25 = vpop.f32.mrb[3].mxu1  ;;  %5223 = vmatprep.subr.bf16.mxu1 %v5746_v10  ;;  %v3460_v28 = vadd.f32 %v4899_v18, %v4495_v9  ;;  %v5784_v18 = vld [vmem:[%s7238_s1 + $0x838] sm:$0xff]   ;;  %v182_v20 = vcombine.high %v30_v16, %v30_v16 }
  0xfb   :  { %v5785_v21 = vld [vmem:[%s7238_s1 + $0x8b8] sm:$0xff]   ;;  %v5787_v25 = vld [vmem:[%s7238_s1 + $0x940] sm:$0xff]  }
  0xfc   :  { %v6758_v33 = vadd.f32 %v4921_v19, %v3460_v28  ;;  %5202 = vmatpush3.bf16.msra.mxu0 %v5747_v13  ;;  %v189_v19 = vrot.slane %v30_v16, %v6050_v41  ;;  %v196_v24 = vrot.slane %v182_v20, %v6050_v41  ;;  %v5820_v16 = vld [vmem:[%s7238_s1 + $0xa40] sm:$0xff]  }
  0xfd   :  { %5224 = vmatpush3.bf16.msra.mxu1 %v5748_v14  ;;  %5203 = vmatprep.subr.bf16.mxu0 %v5749_v17 }
  0xfe   :  { %5225 = vmatprep.subr.bf16.mxu1 %v5750_v22  ;;  %v197_v23 = vcombine.high %v189_v19, %v189_v19  ;;  %v198_v28 = vcombine.high %v196_v24, %v196_v24  ;;  %v332_v31 = vpack.c.bf16 %v196_v24, %v196_v24 }
 0x100   :  { %5204 = vmatpush3.bf16.msra.mxu0 %v5751_v29  ;;  %v331_v27 = vpack.c.bf16 %v197_v23, %v197_v23  ;;  %v5789_v29 = vld [vmem:[%s7238_s1 + $0x900] sm:$0xff]  }
 0x101   :  { %5226 = vmatpush3.bf16.msra.mxu1 %v5752_v30  ;;  %5233 = vmatprep.subr.bf16.mxu0 %v5754_v34  ;;  %v330_v30 = vpack.c.bf16 %v189_v19, %v189_v19  ;;  %v5791_v34 = vld [vmem:[%s7238_s1 + $0x948] sm:$0xff]   ;;  %v5823_v23 = vld [vmem:[%s7238_s1 + $0xa80] sm:$0xff]  }
 0x102   :  { %5255 = vmatprep.subr.bf16.mxu1 %v5755_v37  ;;  %v5794_v37 = vld [vmem:[%s7238_s1 + $0x988] sm:$0xff]  }
 0x103   :  { %4018 = vmatmul.mubr.bf16.vlgmr.msra.gmra.mrb[28].mxu0 %v326_v40  ;;  %v5797_v40 = vld [vmem:[%s7238_s1 + $0x910] sm:$0xff]  }
 0x104   :  { %4058 = vmatmul.mubr.bf16.vlgmr.msra.gmra.mrb[28].mxu1 %v328_v42  ;;  %5234 = vmatpush3.bf16.msra.mxu0 %v5756_v38  ;;  %v5795_v38 = vld [vmem:[%s7238_s1 + $0x950] sm:$0xff]  }
 0x105   :  { %5256 = vmatpush3.bf16.msra.mxu1 %v5757_v43  ;;  %5235 = vmatprep.subr.bf16.mxu0 %v5758_v44  ;;  %v5798_v42 = vld [vmem:[%s7238_s1 + $0x990] sm:$0xff]   ;;  %v5799_v43 = vld [vmem:[%s7238_s1 + $0x958] sm:$0xff]  }
 0x106   :  { %5257 = vmatprep.subr.bf16.mxu1 %v5759_v45  ;;  %4097 = vmatprep.mubr.bf16.mxu0 %v331_v27  ;;  %v5800_v44 = vld [vmem:[%s7238_s1 + $0x9d8] sm:$0xff]   ;;  %v5826_v27 = vld [vmem:[%s7238_s1 + $0xa08] sm:$0xff]  }
 0x107   :  { %v5801_v45 = vld [vmem:[%s7238_s1 + $0x918] sm:$0xff]  }
 0x108   :  { %5236 = vmatpush3.bf16.msra.mxu0 %v5760_v46  ;;  %v5802_v46 = vld [vmem:[%s7238_s1 + $0x998] sm:$0xff]  }
 0x109   :  { %5258 = vmatpush3.bf16.msra.mxu1 %v5761_v47  ;;  %5237 = vmatprep.subr.bf16.mxu0 %v5762_v48  ;;  %v5803_v47 = vld [vmem:[%s7238_s1 + $0x960] sm:$0xff]  }
 0x10a   :  { %5259 = vmatprep.subr.bf16.mxu1 %v5763_v49  ;;  %v5804_v48 = vld [vmem:[%s7238_s1 + $0x9e0] sm:$0xff]  }
 0x10b   :  { %v5805_v49 = vld [vmem:[%s7238_s1 + $0x920] sm:$0xff]  }
 0x10c   :  { %5238 = vmatpush3.bf16.msra.mxu0 %v5764_v50  ;;  %v5806_v50 = vld [vmem:[%s7238_s1 + $0x9a0] sm:$0xff]  }
 0x10d   :  { %5260 = vmatpush3.bf16.msra.mxu1 %v5765_v51  ;;  %5239 = vmatprep.subr.bf16.mxu0 %v5766_v52  ;;  %v5807_v51 = vld [vmem:[%s7238_s1 + $0x968] sm:$0xff]  }
 0x10e   :  { %5261 = vmatprep.subr.bf16.mxu1 %v5767_v53  ;;  %v5808_v52 = vld [vmem:[%s7238_s1 + $0x9e8] sm:$0xff]  }
 0x10f   :  { %v5809_v53 = vld [vmem:[%s7238_s1 + $0x928] sm:$0xff]  }
 0x110   :  { %5240 = vmatpush3.bf16.msra.mxu0 %v5768_v54  ;;  %v5810_v54 = vld [vmem:[%s7238_s1 + $0x9a8] sm:$0xff]  }
 0x111   :  { %5262 = vmatpush3.bf16.msra.mxu1 %v5769_v55  ;;  %5241 = vmatprep.subr.bf16.mxu0 %v5770_v56  ;;  %v5811_v55 = vld [vmem:[%s7238_s1 + $0x970] sm:$0xff]  }
 0x112   :  { %5263 = vmatprep.subr.bf16.mxu1 %v5771_v57  ;;  %v5812_v56 = vld [vmem:[%s7238_s1 + $0x9f0] sm:$0xff]  }
 0x114   :  { %5242 = vmatpush3.bf16.msra.mxu0 %v5772_v58 }
 0x115   :  { %5264 = vmatpush3.bf16.msra.mxu1 %v5773_v59  ;;  %5243 = vmatprep.subr.bf16.mxu0 %v5774_v60  ;;  %v5813_v59 = vld [vmem:[%s7238_s1 + $0x930] sm:$0xff]  }
 0x116   :  { %5265 = vmatprep.subr.bf16.mxu1 %v5775_v61  ;;  %v4941_v2 = vpop.f32.mrb[4].mxu0  ;;  %v5814_v60 = vld [vmem:[%s7238_s1 + $0x9b0] sm:$0xff]  }
 0x117   :  { %v4963_v3 = vpop.f32.mrb[4].mxu1  ;;  %v4942_v6 = vpop.f32.mrb[5].mxu0 }
 0x118   :  { %v4964_v7 = vpop.f32.mrb[5].mxu1  ;;  %v4943_v9 = vadd.f32 %v4942_v6, %v4941_v2  ;;  %v4944_v11 = vpop.f32.mrb[6].mxu0  ;;  %5244 = vmatpush3.bf16.msra.mxu0 %v5776_v62  ;;  %v5816_v6 = vld [vmem:[%s7238_s1 + $0x9f8] sm:$0xff]  }
 0x119   :  { %v4965_v10 = vadd.f32 %v4964_v7, %v4963_v3  ;;  %v4966_v12 = vpop.f32.mrb[6].mxu1  ;;  %5266 = vmatpush3.bf16.msra.mxu1 %v5777_v63  ;;  %v4945_v13 = vpop.f32.mrb[7].mxu0  ;;  %5245 = vmatprep.subr.bf16.mxu0 %v5778_v0 }
 0x11a   :  { %v4967_v14 = vpop.f32.mrb[7].mxu1  ;;  %5267 = vmatprep.subr.bf16.mxu1 %v5779_v1  ;;  %v3540_v17 = vadd.f32 %v4943_v9, %v6758_v33  ;;  %v333_v33 = vpack.c.bf16 %v198_v28, %v198_v28  ;;  %v5817_v9 = vld [vmem:[%s7238_s1 + $0x938] sm:$0xff]   ;;  %v5827_v28 = vld [vmem:[%s7238_s1 + $0xa88] sm:$0xff]  }
 0x11b   :  { %v5818_v13 = vld [vmem:[%s7238_s1 + $0x9b8] sm:$0xff]  }
 0x11c   :  { %v6861_v22 = vadd.f32 %v4965_v10, %v3540_v17  ;;  %5246 = vmatpush3.bf16.msra.mxu0 %v5780_v4  ;;  %4137 = vmatprep.mubr.bf16.mxu1 %v333_v33  ;;  %v5821_v17 = vld [vmem:[%s7238_s1 + $0xac0] sm:$0xff]   ;;  %v5832_v33 = vld [vmem:[%s7238_s1 + $0xa58] sm:$0xff]  }
 0x11d   :  { %5268 = vmatpush3.bf16.msra.mxu1 %v5781_v5  ;;  %5247 = vmatprep.subr.bf16.mxu0 %v5782_v8  ;;  %v5815_v5 = vld [vmem:[%s7238_s1 + $0x978] sm:$0xff]   ;;  %v31_v8 = vld [vmem:[%s7237_s0 + $0x48] sm:$0xff] }
 0x11e   :  { %5269 = vmatprep.subr.bf16.mxu1 %v5783_v15  ;;  %v206_v10 = vrot.slane %v31_v8, %v6050_v41  ;;  %v199_v11 = vcombine.high %v31_v8, %v31_v8  ;;  %v5854_v8 = vld [vmem:[%s7238_s1 + $0xbc0] sm:$0xff]  }
 0x120   :  { %5248 = vmatpush3.bf16.msra.mxu0 %v5784_v18  ;;  %v214_v14 = vcombine.high %v206_v10, %v206_v10  ;;  %v213_v15 = vrot.slane %v199_v11, %v6050_v41  ;;  %v334_v20 = vpack.c.bf16 %v206_v10, %v206_v10  ;;  %v5855_v10 = vld [vmem:[%s7238_s1 + $0xb00] sm:$0xff]  }
 0x121   :  { %5270 = vmatpush3.bf16.msra.mxu1 %v5785_v21  ;;  %5277 = vmatprep.subr.bf16.mxu0 %v5787_v25  ;;  %v5822_v21 = vld [vmem:[%s7238_s1 + $0xa00] sm:$0xff]   ;;  %v5824_v25 = vld [vmem:[%s7238_s1 + $0xa48] sm:$0xff]  }
 0x122   :  { %5299 = vmatprep.subr.bf16.mxu1 %v5788_v26  ;;  %v335_v18 = vpack.c.bf16 %v214_v14, %v214_v14  ;;  %v215_v19 = vcombine.high %v213_v15, %v213_v15  ;;  %v5825_v26 = vld [vmem:[%s7238_s1 + $0xac8] sm:$0xff]  }
 0x123   :  { %4098 = vmatmul.mubr.bf16.vlgmr.msra.gmra.mrb[32].mxu0 %v330_v30  ;;  %v5829_v30 = vld [vmem:[%s7238_s1 + $0xad0] sm:$0xff]  }
 0x124   :  { %4138 = vmatmul.mubr.bf16.vlgmr.msra.gmra.mrb[32].mxu1 %v332_v31  ;;  %5278 = vmatpush3.bf16.msra.mxu0 %v5789_v29  ;;  %v337_v24 = vpack.c.bf16 %v215_v19, %v215_v19  ;;  %v5828_v29 = vld [vmem:[%s7238_s1 + $0xa50] sm:$0xff]   ;;  %v5860_v19 = vld [vmem:[%s7238_s1 + $0xb88] sm:$0xff]  }
 0x125   :  { %5300 = vmatpush3.bf16.msra.mxu1 %v5790_v32  ;;  %5279 = vmatprep.subr.bf16.mxu0 %v5791_v34  ;;  %v5830_v31 = vld [vmem:[%s7238_s1 + $0xa10] sm:$0xff]   ;;  %v5833_v34 = vld [vmem:[%s7238_s1 + $0xad8] sm:$0xff]  }
 0x126   :  { %5301 = vmatprep.subr.bf16.mxu1 %v5792_v35  ;;  %4177 = vmatprep.mubr.bf16.mxu0 %v335_v18  ;;  %v5831_v32 = vld [vmem:[%s7238_s1 + $0xa90] sm:$0xff]   ;;  %v5834_v35 = vld [vmem:[%s7238_s1 + $0xa18] sm:$0xff]   ;;  %v5859_v18 = vld [vmem:[%s7238_s1 + $0xb08] sm:$0xff]  }
 0x127   :  { %4217 = vmatprep.mubr.bf16.mxu1 %v337_v24  ;;  %v5865_v24 = vld [vmem:[%s7238_s1 + $0xb58] sm:$0xff]  }
 0x128   :  { %5280 = vmatpush3.bf16.msra.mxu0 %v5793_v36  ;;  %v5835_v36 = vld [vmem:[%s7238_s1 + $0xa98] sm:$0xff]  }
 0x129   :  { %5302 = vmatpush3.bf16.msra.mxu1 %v5794_v37  ;;  %5281 = vmatprep.subr.bf16.mxu0 %v5795_v38  ;;  %v5836_v37 = vld [vmem:[%s7238_s1 + $0xa60] sm:$0xff]  }
 0x12a   :  { %5303 = vmatprep.subr.bf16.mxu1 %v5796_v39  ;;  %v5837_v38 = vld [vmem:[%s7238_s1 + $0xae0] sm:$0xff]  }
 0x12b   :  { %v5838_v39 = vld [vmem:[%s7238_s1 + $0xa20] sm:$0xff]  }
 0x12c   :  { %5282 = vmatpush3.bf16.msra.mxu0 %v5797_v40  ;;  %v5839_v40 = vld [vmem:[%s7238_s1 + $0xaa0] sm:$0xff]  }
 0x12d   :  { %5304 = vmatpush3.bf16.msra.mxu1 %v5798_v42  ;;  %5283 = vmatprep.subr.bf16.mxu0 %v5799_v43  ;;  %v5840_v42 = vld [vmem:[%s7238_s1 + $0xa68] sm:$0xff]  }
 0x12e   :  { %5305 = vmatprep.subr.bf16.mxu1 %v5800_v44  ;;  %v5841_v43 = vld [vmem:[%s7238_s1 + $0xae8] sm:$0xff]  }
 0x12f   :  { %v5842_v44 = vld [vmem:[%s7238_s1 + $0xa28] sm:$0xff]  }
 0x130   :  { %5284 = vmatpush3.bf16.msra.mxu0 %v5801_v45  ;;  %v5843_v45 = vld [vmem:[%s7238_s1 + $0xaa8] sm:$0xff]  }
 0x131   :  { %5306 = vmatpush3.bf16.msra.mxu1 %v5802_v46  ;;  %5285 = vmatprep.subr.bf16.mxu0 %v5803_v47  ;;  %v5844_v46 = vld [vmem:[%s7238_s1 + $0xa70] sm:$0xff]  }
 0x132   :  { %5307 = vmatprep.subr.bf16.mxu1 %v5804_v48 }
 0x134   :  { %5286 = vmatpush3.bf16.msra.mxu0 %v5805_v49  ;;  %v5845_v49 = vld [vmem:[%s7238_s1 + $0xaf0] sm:$0xff]  }
 0x135   :  { %5308 = vmatpush3.bf16.msra.mxu1 %v5806_v50  ;;  %5287 = vmatprep.subr.bf16.mxu0 %v5807_v51  ;;  %v5846_v50 = vld [vmem:[%s7238_s1 + $0xa30] sm:$0xff]  }
 0x136   :  { %5309 = vmatprep.subr.bf16.mxu1 %v5808_v52  ;;  %v4985_v57 = vpop.f32.mrb[8].mxu0 }
 0x137   :  { %v5007_v58 = vpop.f32.mrb[8].mxu1  ;;  %v4986_v61 = vpop.f32.mrb[9].mxu0 }
 0x138   :  { %v5008_v62 = vpop.f32.mrb[9].mxu1  ;;  %v4987_v63 = vadd.f32 %v4986_v61, %v4985_v57  ;;  %v4988_v1 = vpop.f32.mrb[10].mxu0  ;;  %5288 = vmatpush3.bf16.msra.mxu0 %v5809_v53  ;;  %v5847_v53 = vld [vmem:[%s7238_s1 + $0xab0] sm:$0xff]   ;;  %v5849_v61 = vld [vmem:[%s7238_s1 + $0xaf8] sm:$0xff]  }
 0x139   :  { %v5009_v0 = vadd.f32 %v5008_v62, %v5007_v58  ;;  %v5010_v2 = vpop.f32.mrb[10].mxu1  ;;  %5310 = vmatpush3.bf16.msra.mxu1 %v5810_v54  ;;  %v4989_v3 = vpop.f32.mrb[11].mxu0  ;;  %5289 = vmatprep.subr.bf16.mxu0 %v5811_v55 }
 0x13a   :  { %v5011_v4 = vpop.f32.mrb[11].mxu1  ;;  %5311 = vmatprep.subr.bf16.mxu1 %v5812_v56  ;;  %v3620_v7 = vadd.f32 %v4987_v63, %v6861_v22  ;;  %v336_v22 = vpack.c.bf16 %v213_v15, %v213_v15  ;;  %v5850_v63 = vld [vmem:[%s7238_s1 + $0xa38] sm:$0xff]   ;;  %v5857_v15 = vld [vmem:[%s7238_s1 + $0xb48] sm:$0xff]  }
 0x13b   :  { %v5851_v2 = vld [vmem:[%s7238_s1 + $0xab8] sm:$0xff]  }
 0x13c   :  { %v6962_v12 = vadd.f32 %v5009_v0, %v3620_v7  ;;  %5290 = vmatpush3.bf16.msra.mxu0 %v5813_v59  ;;  %v32_v0 = vld [vmem:[%s7237_s0 + $0x50] sm:$0xff] }
 0x13d   :  { %5312 = vmatpush3.bf16.msra.mxu1 %v5814_v60  ;;  %5291 = vmatprep.subr.bf16.mxu0 %v5815_v5  ;;  %v5848_v60 = vld [vmem:[%s7238_s1 + $0xa78] sm:$0xff]   ;;  %v223_v3 = vrot.slane %v32_v0, %v6050_v41  ;;  %v216_v4 = vcombine.high %v32_v0, %v32_v0  ;;  %v5853_v5 = vld [vmem:[%s7238_s1 + $0xb40] sm:$0xff]  }
 0x13e   :  { %5313 = vmatprep.subr.bf16.mxu1 %v5816_v6 }
 0x13f   :  { %v231_v6 = vcombine.high %v223_v3, %v223_v3  ;;  %v230_v7 = vrot.slane %v216_v4, %v6050_v41 }
 0x140   :  { %5292 = vmatpush3.bf16.msra.mxu0 %v5817_v9  ;;  %v338_v9 = vpack.c.bf16 %v223_v3, %v223_v3 }
 0x141   :  { %5314 = vmatpush3.bf16.msra.mxu1 %v5818_v13  ;;  %5321 = vmatprep.subr.bf16.mxu0 %v5820_v16  ;;  %v339_v11 = vpack.c.bf16 %v231_v6, %v231_v6  ;;  %v5856_v13 = vld [vmem:[%s7238_s1 + $0xb80] sm:$0xff]   ;;  %v340_v14 = vpack.c.bf16 %v230_v7, %v230_v7 }
 0x142   :  { %5343 = vmatprep.subr.bf16.mxu1 %v5821_v17  ;;  %v5858_v17 = vld [vmem:[%s7238_s1 + $0xbc8] sm:$0xff]  }
 0x143   :  { %4178 = vmatmul.mubr.bf16.vlgmr.msra.gmra.mrb[36].mxu0 %v334_v20  ;;  %v5861_v20 = vld [vmem:[%s7238_s1 + $0xb50] sm:$0xff]  }
 0x144   :  { %4218 = vmatmul.mubr.bf16.vlgmr.msra.gmra.mrb[36].mxu1 %v336_v22  ;;  %5322 = vmatpush3.bf16.msra.mxu0 %v5822_v21  ;;  %v5862_v21 = vld [vmem:[%s7238_s1 + $0xbd0] sm:$0xff]  }
 0x145   :  { %5344 = vmatpush3.bf16.msra.mxu1 %v5823_v23  ;;  %5323 = vmatprep.subr.bf16.mxu0 %v5824_v25  ;;  %v5863_v22 = vld [vmem:[%s7238_s1 + $0xb10] sm:$0xff]   ;;  %v5866_v25 = vld [vmem:[%s7238_s1 + $0xbd8] sm:$0xff]  }
 0x146   :  { %5345 = vmatprep.subr.bf16.mxu1 %v5825_v26  ;;  %4257 = vmatprep.mubr.bf16.mxu0 %v339_v11  ;;  %v5864_v23 = vld [vmem:[%s7238_s1 + $0xb90] sm:$0xff]   ;;  %v5867_v26 = vld [vmem:[%s7238_s1 + $0xb18] sm:$0xff]  }
 0x148   :  { %5324 = vmatpush3.bf16.msra.mxu0 %v5826_v27  ;;  %v5868_v27 = vld [vmem:[%s7238_s1 + $0xb98] sm:$0xff]  }
 0x149   :  { %5346 = vmatpush3.bf16.msra.mxu1 %v5827_v28  ;;  %5325 = vmatprep.subr.bf16.mxu0 %v5828_v29  ;;  %v5869_v28 = vld [vmem:[%s7238_s1 + $0xb60] sm:$0xff]  }
 0x14a   :  { %5347 = vmatprep.subr.bf16.mxu1 %v5829_v30  ;;  %v5870_v29 = vld [vmem:[%s7238_s1 + $0xbe0] sm:$0xff]  }
 0x14b   :  { %v5871_v30 = vld [vmem:[%s7238_s1 + $0xb20] sm:$0xff]  }
 0x14c   :  { %5326 = vmatpush3.bf16.msra.mxu0 %v5830_v31  ;;  %v5872_v31 = vld [vmem:[%s7238_s1 + $0xba0] sm:$0xff]  }
 0x14d   :  { %5348 = vmatpush3.bf16.msra.mxu1 %v5831_v32  ;;  %5327 = vmatprep.subr.bf16.mxu0 %v5832_v33  ;;  %v5873_v32 = vld [vmem:[%s7238_s1 + $0xb68] sm:$0xff]  }
 0x14e   :  { %5349 = vmatprep.subr.bf16.mxu1 %v5833_v34  ;;  %v5874_v33 = vld [vmem:[%s7238_s1 + $0xbe8] sm:$0xff]  }
 0x14f   :  { %v5875_v34 = vld [vmem:[%s7238_s1 + $0xb28] sm:$0xff]  }
 0x150   :  { %5328 = vmatpush3.bf16.msra.mxu0 %v5834_v35  ;;  %v5876_v35 = vld [vmem:[%s7238_s1 + $0xba8] sm:$0xff]  }
 0x151   :  { %5350 = vmatpush3.bf16.msra.mxu1 %v5835_v36  ;;  %5329 = vmatprep.subr.bf16.mxu0 %v5836_v37  ;;  %v5877_v36 = vld [vmem:[%s7238_s1 + $0xb70] sm:$0xff]  }
 0x152   :  { %5351 = vmatprep.subr.bf16.mxu1 %v5837_v38 }
 0x154   :  { %5330 = vmatpush3.bf16.msra.mxu0 %v5838_v39  ;;  %v5878_v39 = vld [vmem:[%s7238_s1 + $0xbf0] sm:$0xff]  }
 0x155   :  { %5352 = vmatpush3.bf16.msra.mxu1 %v5839_v40  ;;  %5331 = vmatprep.subr.bf16.mxu0 %v5840_v42  ;;  %v5879_v40 = vld [vmem:[%s7238_s1 + $0xb30] sm:$0xff]  }
 0x156   :  { %v5029_v47 = vpop.f32.mrb[12].mxu0  ;;  %5353 = vmatprep.subr.bf16.mxu1 %v5841_v43 }
 0x157   :  { %v5051_v48 = vpop.f32.mrb[12].mxu1  ;;  %v5030_v51 = vpop.f32.mrb[13].mxu0 }
 0x158   :  { %v5052_v52 = vpop.f32.mrb[13].mxu1  ;;  %v5031_v54 = vadd.f32 %v5030_v51, %v5029_v47  ;;  %v5032_v56 = vpop.f32.mrb[14].mxu0  ;;  %5332 = vmatpush3.bf16.msra.mxu0 %v5842_v44  ;;  %v5881_v51 = vld [vmem:[%s7238_s1 + $0xb78] sm:$0xff]  }
 0x159   :  { %v5053_v55 = vadd.f32 %v5052_v52, %v5051_v48  ;;  %v5054_v57 = vpop.f32.mrb[14].mxu1  ;;  %5354 = vmatpush3.bf16.msra.mxu1 %v5843_v45  ;;  %v5033_v58 = vpop.f32.mrb[15].mxu0  ;;  %5333 = vmatprep.subr.bf16.mxu0 %v5844_v46  ;;  %v33_v56 = vld [vmem:[%s7237_s0 + $0x58] sm:$0xff] }
 0x15a   :  { %v5055_v59 = vpop.f32.mrb[15].mxu1  ;;  %v3700_v62 = vadd.f32 %v5031_v54, %v6962_v12  ;;  %5355 = vmatprep.subr.bf16.mxu1 %v5845_v49  ;;  %v232_v12 = vcombine.high %v230_v7, %v230_v7 }
 0x15c   :  { %v7065_v1 = vadd.f32 %v5053_v55, %v3700_v62  ;;  %5334 = vmatpush3.bf16.msra.mxu0 %v5846_v50  ;;  %v341_v16 = vpack.c.bf16 %v232_v12, %v232_v12  ;;  %v5880_v50 = vld [vmem:[%s7238_s1 + $0xbb0] sm:$0xff]   ;;  %v5883_v55 = vld [vmem:[%s7238_s1 + $0xb38] sm:$0xff]  }
 0x15d   :  { %5356 = vmatpush3.bf16.msra.mxu1 %v5847_v53  ;;  %5335 = vmatprep.subr.bf16.mxu0 %v5848_v60  ;;  %v5882_v53 = vld [vmem:[%s7238_s1 + $0xbf8] sm:$0xff]  }
 0x15e   :  { %5357 = vmatprep.subr.bf16.mxu1 %v5849_v61  ;;  %4297 = vmatprep.mubr.bf16.mxu1 %v341_v16 }
 0x160   :  { %5336 = vmatpush3.bf16.msra.mxu0 %v5850_v63 }
 0x161   :  { %5358 = vmatpush3.bf16.msra.mxu1 %v5851_v2  ;;  %5365 = vmatprep.subr.bf16.mxu0 %v5853_v5 }
 0x162   :  { %5387 = vmatprep.subr.bf16.mxu1 %v5854_v8 }
 0x163   :  { %4258 = vmatmul.mubr.bf16.vlgmr.msra.gmra.mrb[40].mxu0 %v338_v9 }
 0x164   :  { %5366 = vmatpush3.bf16.msra.mxu0 %v5855_v10  ;;  %4298 = vmatmul.mubr.bf16.vlgmr.msra.gmra.mrb[40].mxu1 %v340_v14 }
 0x165   :  { %5367 = vmatprep.subr.bf16.mxu0 %v5857_v15  ;;  %5388 = vmatpush3.bf16.msra.mxu1 %v5856_v13 }
 0x166   :  { %5389 = vmatprep.subr.bf16.mxu1 %v5858_v17 }
 0x168   :  { %5368 = vmatpush3.bf16.msra.mxu0 %v5859_v18 }
 0x169   :  { %5369 = vmatprep.subr.bf16.mxu0 %v5861_v20  ;;  %5390 = vmatpush3.bf16.msra.mxu1 %v5860_v19 }
 0x16a   :  { %5391 = vmatprep.subr.bf16.mxu1 %v5862_v21 }
 0x16c   :  { %5370 = vmatpush3.bf16.msra.mxu0 %v5863_v22 }
 0x16d   :  { %5371 = vmatprep.subr.bf16.mxu0 %v5865_v24  ;;  %5392 = vmatpush3.bf16.msra.mxu1 %v5864_v23 }
 0x16e   :  { %5393 = vmatprep.subr.bf16.mxu1 %v5866_v25 }
 0x170   :  { %5372 = vmatpush3.bf16.msra.mxu0 %v5867_v26 }
 0x171   :  { %5373 = vmatprep.subr.bf16.mxu0 %v5869_v28  ;;  %5394 = vmatpush3.bf16.msra.mxu1 %v5868_v27 }
 0x172   :  { %5395 = vmatprep.subr.bf16.mxu1 %v5870_v29 }
 0x174   :  { %5374 = vmatpush3.bf16.msra.mxu0 %v5871_v30 }
 0x175   :  { %5375 = vmatprep.subr.bf16.mxu0 %v5873_v32  ;;  %5396 = vmatpush3.bf16.msra.mxu1 %v5872_v31 }
 0x176   :  { %v5073_v37 = vpop.f32.mrb[16].mxu0  ;;  %5397 = vmatprep.subr.bf16.mxu1 %v5874_v33 }
 0x177   :  { %v5095_v38 = vpop.f32.mrb[16].mxu1  ;;  %v5074_v42 = vpop.f32.mrb[17].mxu0 }
 0x178   :  { %v5096_v43 = vpop.f32.mrb[17].mxu1  ;;  %v5075_v44 = vadd.f32 %v5074_v42, %v5073_v37  ;;  %v5076_v46 = vpop.f32.mrb[18].mxu0  ;;  %5376 = vmatpush3.bf16.msra.mxu0 %v5875_v34 }
 0x179   :  { %v5097_v45 = vadd.f32 %v5096_v43, %v5095_v38  ;;  %v5098_v47 = vpop.f32.mrb[18].mxu1  ;;  %v5077_v48 = vpop.f32.mrb[19].mxu0  ;;  %5377 = vmatprep.subr.bf16.mxu0 %v5877_v36  ;;  %5398 = vmatpush3.bf16.msra.mxu1 %v5876_v35 }
 0x17a   :  { %v5099_v49 = vpop.f32.mrb[19].mxu1  ;;  %v3780_v52 = vadd.f32 %v5075_v44, %v7065_v1  ;;  %5399 = vmatprep.subr.bf16.mxu1 %v5878_v39 }
 0x17c   :  { %v3820_v54 = vadd.f32 %v5097_v45, %v3780_v52  ;;  %5378 = vmatpush3.bf16.msra.mxu0 %v5879_v40 }
 0x17d   :  { %10 = vsyncpa [#allocation3], 0  ;;  %5379 = vmatprep.subr.bf16.mxu0 %v5881_v51  ;;  %v240_v57 = vrot.slane %v33_v56, %v6050_v41  ;;  %v233_v58 = vcombine.high %v33_v56, %v33_v56  ;;  %5400 = vmatpush3.bf16.msra.mxu1 %v5880_v50  ;;  %v5884_v59 = vld [vmem:[%s7238_s1 + $0xbb8] sm:$0xff]   ;;  %v4386_v26 = vld [vmem:[%s7240_s3] sm:$0xff]  ;;  %v5911_v29 = vmov 0.0|0.0   ;;  %vm5912_vm0 = vmmov 0  }
 0x17e   :  { %5401 = vmatprep.subr.bf16.mxu1 %v5882_v53  ;;  %v4387_v27 = vld [vmem:[%s7240_s3 + $0x8] sm:$0xff]  ;;  %v4388_v28 = vld [vmem:[%s7240_s3 + $0x10] sm:$0xff]  ;;  %v4389_v31 = vld [vmem:[%s7240_s3 + $0x18] sm:$0xff]  ;;  %s5914_s29 = smov [#allocation2]   ;;  %vm4479_vm1 = vcmask 254976  }
 0x17f   :  { %v248_v60 = vcombine.high %v240_v57, %v240_v57  ;;  %v247_v61 = vrot.slane %v233_v58, %v6050_v41  ;;  %v342_v62 = vpack.c.bf16 %v240_v57, %v240_v57  ;;  %v5462_v30 = vpack.c.bf16 %v4387_v27, %v4386_v26  ;;  %v4390_v33 = vld [vmem:[%s7240_s3 + $0x20] sm:$0xff]  ;;  %v4391_v34 = vld [vmem:[%s7240_s3 + $0x28] sm:$0xff]  ;;  %v4392_v36 = vld [vmem:[%s7240_s3 + $0x30] sm:$0xff]  ;;  %s4487_s30 = sshll.u32 %s5914_s29, 4  ;;  %s4488_s30 = int_to_ptr.vmem [resolvable:$true] %s4487_s30 }
 0x180   :  { %5380 = vmatpush3.bf16.msra.mxu0 %v5883_v55  ;;  %v5465_v32 = vpack.c.bf16 %v4389_v31, %v4388_v28  ;;  %v5468_v35 = vpack.c.bf16 %v4391_v34, %v4390_v33  ;;  %v4393_v37 = vld [vmem:[%s7240_s3 + $0x38] sm:$0xff]  ;;  %v4394_v39 = vld [vmem:[%s7240_s3 + $0x40] sm:$0xff]  ;;  %v4395_v40 = vld [vmem:[%s7240_s3 + $0x48] sm:$0xff]  ;;  %s5886_s6 = scalar_lea.vmem %s4488_s30, 32  ;;  %p5891_p1 = scmp.lt.s32.totalorder %s4488_s30, %s4488_s30 }
 0x181   :  { %v343_v63 = vpack.c.bf16 %v248_v60, %v248_v60  ;;  %v249_v0 = vcombine.high %v247_v61, %v247_v61  ;;  %5402 = vmatpush3.bf16.msra.mxu1 %v5884_v59  ;;  %v344_v1 = vpack.c.bf16 %v247_v61, %v247_v61  ;;  %5461 = vmatprep.subr.bf16.mxu0 %v5911_v29  ;;  %v4396_v43 = vld [vmem:[%s7240_s3 + $0x50] sm:$0xff]  ;;  %v4397_v44 = vld [vmem:[%s7240_s3 + $0x58] sm:$0xff]  ;;  %v4398_v56 = vld [vmem:[%s7240_s3 + $0x60] sm:$0xff]  ;;  %p5887_p0 = scmp.ne.s32.totalorder %s4488_s30, %s5886_s6  ;;  %p5892_p2 = scmp.lt.s32.totalorder %s5886_s6, %s5886_s6 }
 0x182   :  { %v5471_v38 = vpack.c.bf16 %v4393_v37, %v4392_v36  ;;  %v5474_v42 = vpack.c.bf16 %v4395_v40, %v4394_v39  ;;  %v5477_v45 = vpack.c.bf16 %v4397_v44, %v4396_v43  ;;  %v4399_v57 = vld [vmem:[%s7240_s3 + $0x68] sm:$0xff]  ;;  %v4400_v61 = vld [vmem:[%s7240_s3 + $0x70] sm:$0xff] }
 0x183   :  { %4337 = vmatprep.mubr.bf16.mxu0 %v343_v63  ;;  %v345_v2 = vpack.c.bf16 %v249_v0, %v249_v0  ;;  %v5480_v59 = vpack.c.bf16 %v4399_v57, %v4398_v56  ;;  %v5913_v0 = vmov 0.0   ;;  %p5893_p3 = por %p5892_p2, %p5891_p1 }
 0x184   :  { %4338 = vmatmul.mubr.bf16.vlgmr.msra.gmra.mrb[44].mxu0 %v342_v62  ;;  %v4401_v62 = vld [vmem:[%s7240_s3 + $0x78] sm:$0xff] }
 0x185   :  { %4377 = vmatprep.mubr.bf16.mxu1 %v345_v2  ;;  %5463 = vmatpush3.bf16.msra.mxu0 %v5462_v30  ;;  %v5483_v63 = vpack.c.bf16 %v4401_v62, %v4400_v61  ;;  %p5894_p4 = pnand %p5893_p3, %p5887_p0 }
 0x186   :  { %4378 = vmatmul.mubr.bf16.vlgmr.msra.gmra.mrb[44].mxu1 %v344_v1  ;;  %5464 = vmatprep.subr.bf16.mxu0 %v5911_v29 }
 0x187   :  { %5458 = vmatprep.mubr.msk.f32.mxu0 %vm5912_vm0, %v5913_v0 }
 0x189   :  { %5466 = vmatpush3.bf16.msra.mxu0 %v5465_v32 }
 0x18a   :  { %5467 = vmatprep.subr.bf16.mxu0 %v5911_v29 }
 0x18d   :  { %5469 = vmatpush3.bf16.msra.mxu0 %v5468_v35 }
 0x18e   :  { %5470 = vmatprep.subr.bf16.mxu0 %v5911_v29 }
 0x191   :  { %5472 = vmatpush3.bf16.msra.mxu0 %v5471_v38 }
 0x192   :  { %5473 = vmatprep.subr.bf16.mxu0 %v5911_v29 }
 0x195   :  { %5475 = vmatpush3.bf16.msra.mxu0 %v5474_v42 }
 0x196   :  { %v5117_v3 = vpop.f32.mrb[20].mxu0  ;;  %5476 = vmatprep.subr.bf16.mxu0 %v5911_v29 }
 0x197   :  { %v5139_v4 = vpop.f32.mrb[20].mxu1  ;;  %v5118_v5 = vpop.f32.mrb[21].mxu0 }
 0x198   :  { %v5140_v6 = vpop.f32.mrb[21].mxu1  ;;  %v5119_v7 = vadd.f32 %v5118_v5, %v5117_v3  ;;  %v5120_v9 = vpop.f32.mrb[22].mxu0 }
 0x199   :  { %v5141_v8 = vadd.f32 %v5140_v6, %v5139_v4  ;;  %v5142_v10 = vpop.f32.mrb[22].mxu1  ;;  %v5121_v41 = vpop.f32.mrb[23].mxu0  ;;  %5478 = vmatpush3.bf16.msra.mxu0 %v5477_v45 }
 0x19a   :  { %v5143_v11 = vpop.f32.mrb[23].mxu1  ;;  %v3860_v12 = vadd.f32 %v5119_v7, %v3820_v54  ;;  %5479 = vmatprep.subr.bf16.mxu0 %v5911_v29 }
 0x19c   :  { %v3900_v13 = vadd.f32 %v5141_v8, %v3860_v12 }
 0x19d   :  { %5481 = vmatpush3.bf16.msra.mxu0 %v5480_v59 }
 0x19e   :  { %5482 = vmatprep.subr.bf16.mxu0 %v5911_v29 }
 0x1a1   :  { %5484 = vmatpush3.bf16.msra.mxu0 %v5483_v63 }
 0x1b6   :  { %v5161_v14 = vpop.f32.mrb[24].mxu0 }
 0x1b7   :  { %v5183_v15 = vpop.f32.mrb[24].mxu1  ;;  %v5162_v16 = vpop.f32.mrb[25].mxu0 }
 0x1b8   :  { %v5184_v17 = vpop.f32.mrb[25].mxu1  ;;  %v5163_v18 = vadd.f32 %v5162_v16, %v5161_v14  ;;  %v5164_v20 = vpop.f32.mrb[26].mxu0 }
 0x1b9   :  { %v5185_v19 = vadd.f32 %v5184_v17, %v5183_v15  ;;  %v5186_v21 = vpop.f32.mrb[26].mxu1  ;;  %v5165_v22 = vpop.f32.mrb[27].mxu0 }
 0x1ba   :  { %v5187_v23 = vpop.f32.mrb[27].mxu1  ;;  %v3940_v24 = vadd.f32 %v5163_v18, %v3900_v13 }
 0x1bc   :  { %v3980_v25 = vadd.f32 %v5185_v19, %v3940_v24 }
 0x1d6   :  { %v5205_v46 = vpop.f32.mrb[28].mxu0 }
 0x1d7   :  { %v5227_v47 = vpop.f32.mrb[28].mxu1  ;;  %v5206_v48 = vpop.f32.mrb[29].mxu0 }
 0x1d8   :  { %v5228_v49 = vpop.f32.mrb[29].mxu1  ;;  %v5207_v50 = vadd.f32 %v5206_v48, %v5205_v46  ;;  %v5208_v52 = vpop.f32.mrb[30].mxu0 }
 0x1d9   :  { %v5229_v51 = vadd.f32 %v5228_v49, %v5227_v47  ;;  %v5230_v53 = vpop.f32.mrb[30].mxu1  ;;  %v5209_v54 = vpop.f32.mrb[31].mxu0 }
 0x1da   :  { %v5231_v55 = vpop.f32.mrb[31].mxu1  ;;  %v4020_v58 = vadd.f32 %v5207_v50, %v3980_v25  ;;  %v4880_v50 = vld [vmem:[%s7241_s4] ss:$0 sm:$0xff] }
 0x1dc   :  { %v4060_v60 = vadd.f32 %v5229_v51, %v4020_v58 }
 0x1f6   :  { %v5249_v1 = vpop.f32.mrb[32].mxu0 }
 0x1f7   :  { %v5271_v2 = vpop.f32.mrb[32].mxu1  ;;  %v5250_v3 = vpop.f32.mrb[33].mxu0 }
 0x1f8   :  { %v5272_v4 = vpop.f32.mrb[33].mxu1  ;;  %v5251_v5 = vadd.f32 %v5250_v3, %v5249_v1  ;;  %v5252_v7 = vpop.f32.mrb[34].mxu0 }
 0x1f9   :  { %v5273_v6 = vadd.f32 %v5272_v4, %v5271_v2  ;;  %v5274_v8 = vpop.f32.mrb[34].mxu1  ;;  %v5253_v9 = vpop.f32.mrb[35].mxu0 }
 0x1fa   :  { %v5275_v10 = vpop.f32.mrb[35].mxu1  ;;  %v4100_v41 = vadd.f32 %v5251_v5, %v4060_v60 }
 0x1fc   :  { %v4140_v11 = vadd.f32 %v5273_v6, %v4100_v41 }
 0x216   :  { %v5293_v12 = vpop.f32.mrb[36].mxu0 }
 0x217   :  { %v5315_v13 = vpop.f32.mrb[36].mxu1  ;;  %v5294_v14 = vpop.f32.mrb[37].mxu0 }
 0x218   :  { %v5295_v15 = vadd.f32 %v5294_v14, %v5293_v12  ;;  %v5316_v16 = vpop.f32.mrb[37].mxu1  ;;  %v5296_v17 = vpop.f32.mrb[38].mxu0 }
 0x219   :  { %v5317_v18 = vadd.f32 %v5316_v16, %v5315_v13  ;;  %v5318_v19 = vpop.f32.mrb[38].mxu1  ;;  %v5297_v20 = vpop.f32.mrb[39].mxu0 }
 0x21a   :  { %v4180_v21 = vadd.f32 %v5295_v15, %v4140_v11  ;;  %v5319_v22 = vpop.f32.mrb[39].mxu1 }
 0x21c   :  { %v4220_v23 = vadd.f32 %v5317_v18, %v4180_v21 }
 0x236   :  { %v5337_v24 = vpop.f32.mrb[40].mxu0 }
 0x237   :  { %v5338_v25 = vpop.f32.mrb[41].mxu0  ;;  %v5359_v26 = vpop.f32.mrb[40].mxu1 }
 0x238   :  { %v5339_v27 = vadd.f32 %v5338_v25, %v5337_v24  ;;  %v5340_v28 = vpop.f32.mrb[42].mxu0  ;;  %v5360_v29 = vpop.f32.mrb[41].mxu1 }
 0x239   :  { %v5341_v30 = vpop.f32.mrb[43].mxu0  ;;  %v5361_v32 = vadd.f32 %v5360_v29, %v5359_v26  ;;  %v5362_v33 = vpop.f32.mrb[42].mxu1 }
 0x23a   :  { %v4260_v31 = vadd.f32 %v5339_v27, %v4220_v23  ;;  %v5363_v34 = vpop.f32.mrb[43].mxu1 }
 0x23c   :  { %v4300_v35 = vadd.f32 %v5361_v32, %v4260_v31 }
 0x257   :  { %v5381_v36 = vpop.f32.mrb[44].mxu0 }
 0x258   :  { %v5382_v37 = vpop.f32.mrb[45].mxu0 }
 0x259   :  { %v5403_v38 = vpop.f32.mrb[44].mxu1  ;;  %v5383_v39 = vadd.f32 %v5382_v37, %v5381_v36  ;;  %v5384_v40 = vpop.f32.mrb[46].mxu0 }
 0x25a   :  { %v5404_v42 = vpop.f32.mrb[45].mxu1  ;;  %v5385_v43 = vpop.f32.mrb[47].mxu0 }
 0x25b   :  { %v4340_v44 = vadd.f32 %v5383_v39, %v4300_v35  ;;  %v5405_v45 = vadd.f32 %v5404_v42, %v5403_v38  ;;  %v5406_v46 = vpop.f32.mrb[46].mxu1 }
 0x25c   :  { %v5407_v47 = vpop.f32.mrb[47].mxu1 }
 0x25d   :  { %v4380_v48 = vadd.f32 %v5405_v45, %v4340_v44 }
 0x25f   :  { %v4385_v49 = vmax.f32 %v4380_v48, 0.0 }
 0x261   :  { %5459 = vmatmul.mubr.f32.vlgmr.msra.gmra.mrb[48].mxu0 %v4385_v49 }
 0x334   :  { %v4475_v51 = vpop.f32.mrb[48].mxu0 }
 0x335   :  { %v4476_v52 = vadd.f32 %v4880_v50, %v4475_v51  ;;  %v5460_v53 = vpop.f32.mrb[49].mxu0 }
 0x337   :  { %4480 = vst.msk [vmem:[#allocation2] sm:$0x3] %vm4479_vm1, %v4476_v52 }
 0x338   :  { %5897 = shalt.err (!%p5894_p4)
}
 0x339   :  { %s5898_s9 = scalar_lea.hbm %s7242_s5, 32 }
 0x33a   :  { %p5899_p5 = scmp.ne.s32.totalorder %s7242_s5, %s5898_s9  ;;  %p5902_p6 = scmp.lt.u32.totalorder %s5898_s9, %s7242_s5 }
 0x33c   :  { %p5904_p7 = pnand %p5902_p6, %p5899_p5 }
 0x33e   :  { %5907 = shalt.err (!%p5904_p7)
}
 0x33f   :  { %4490 = dma.vmem_to_hbm [thread:$0]  %s4488_s30, 32, %s7242_s5, [#allocation3]  }
 0x340   :  { %5908 = dma.done.wait [#allocation3], 32  }
 0x341   :  { %5909 = vsyncadd [#allocation3], 4294967264 }
 0x342   :  { %4494 = vsyncpa [#allocation3], 1 }

</bundles_post_ra>
